<compile_context>
chip_gen: v5e
topology: v5e:2x2
jax: 0.10.0
libtpu: 0.0.40
codegen_flags: <defaults>
</compile_context>

<pallas_src>
import functools

import jax
import jax.numpy as jnp
from jax.experimental import pallas as pl
from jax.experimental.pallas import tpu as pltpu


def _round_up(x, m):
    return ((x + m - 1) // m) * m


def _vq_kernel(x_ref, et_ref, e_ref, esq_ref,            # inputs
               q_ref, enc_ref, sse_ref, cnt_ref,         # outputs
               sse_acc, cnt_acc,                         # scratch accumulators
               *, n_valid, tile_n, inner_tiles):
    i = pl.program_id(0)            # outer ("parallel") half
    j = pl.program_id(1)            # inner ("arbitrary") reduction axis

    @pl.when(j == 0)
    def _():
        sse_acc[...] = jnp.zeros_like(sse_acc)
        cnt_acc[...] = jnp.zeros_like(cnt_acc)

    x = x_ref[...]                                        # (tile_n, DP) f32

    # argmin_k ||x - e_k||^2 == argmin_k (||e_k||^2 - 2 x.e_k): the per-row
    # ||x||^2 term is constant across k and is dropped.  et_ref holds (2*e)^T
    # in bf16 (native MXU rate); esq_ref holds ||e||^2 + 1e30 on padded codes.
    xe2 = jnp.dot(x.astype(jnp.bfloat16), et_ref[...],
                  preferred_element_type=jnp.float32)     # (tile_n, KP)
    scores = esq_ref[...] - xe2
    idx = jnp.argmin(scores, axis=1)                      # first-min tie-break

    col = jax.lax.broadcasted_iota(jnp.int32, scores.shape, 1)
    onehot = (col == idx[:, None]).astype(jnp.float32)    # (tile_n, KP)
    enc_ref[...] = onehot.astype(enc_ref.dtype)           # bf16 store (exact 0/1)

    # Exact codebook-row selection in f32.
    quant = jnp.dot(onehot, e_ref[...], preferred_element_type=jnp.float32)
    # Straight-through estimator value == inputs + (quant - inputs).detach()
    # == quant, so store quant directly.
    q_ref[...] = quant.astype(q_ref.dtype)

    diff = quant - x
    d2 = diff * diff
    tile_start = (i * inner_tiles + j) * tile_n

    @pl.when(tile_start + tile_n <= n_valid)              # full tile: no mask
    def _():
        sse_acc[...] += jnp.sum(d2, axis=0, keepdims=True)
        cnt_acc[...] += jnp.sum(onehot, axis=0, keepdims=True)

    @pl.when(tile_start + tile_n > n_valid)               # ragged last tile
    def _():
        row = jax.lax.broadcasted_iota(jnp.int32, (tile_n, 1), 0)
        w = ((tile_start + row) < n_valid).astype(jnp.float32)
        sse_acc[...] += jnp.sum(w * d2, axis=0, keepdims=True)
        cnt_acc[...] += jnp.sum(w * onehot, axis=0, keepdims=True)

    @pl.when(j == inner_tiles - 1)
    def _():
        sse_ref[...] = sse_acc[...]
        cnt_ref[...] = cnt_acc[...]


def vector_quantizer_ema_forward(x_nchw, embedding, commitment_cost,
                                 *, tile_n=1024):
    """x_nchw: (B, C, H, W); embedding: (K, D) with D == C."""
    B, C, H, W = x_nchw.shape
    K, D = embedding.shape
    assert D == C, "embedding_dim must equal channel count"

    # NCHW -> NHWC -> (N, D)
    flat = jnp.transpose(x_nchw, (0, 2, 3, 1)).reshape(-1, D).astype(jnp.float32)
    N = flat.shape[0]

    DP = _round_up(D, 128)
    KP = _round_up(K, 128)

    # Largest tile_n (multiple of 16 for the bf16 encodings tile) that fits a
    # conservative VMEM budget valid on every generation (v7x incl.).
    tile_n = max(16, min(_round_up(N, 16), _round_up(int(tile_n), 16)))
    budget = 28 << 20
    while True:
        need = (4 * tile_n * DP * 4          # x in + q out, double-buffered f32
                + 2 * tile_n * KP * 2        # enc out, double-buffered bf16
                + 2 * KP * DP * 4            # resident f32 codebook
                + 2 * DP * KP * 2            # resident bf16 (2*e)^T
                + 4 * tile_n * KP * 4        # scores / onehot / xe2 temporaries
                + 2 * tile_n * DP * 4)       # diff / d2 temporaries
        if need <= budget or tile_n <= 16:
            break
        tile_n = max(16, _round_up(tile_n // 2, 16))
    vmem_limit = int(min(32 << 20, max(8 << 20, 2 * need)))

    tiles_total = (N + tile_n - 1) // tile_n
    num_outer = 2 if tiles_total >= 2 else 1     # both TensorCores on v7x
    inner_tiles = (tiles_total + num_outer - 1) // num_outer
    NP = num_outer * inner_tiles * tile_n

    flat_p = jnp.pad(flat, ((0, NP - N), (0, DP - D)))
    e_p = jnp.pad(embedding.astype(jnp.float32), ((0, KP - K), (0, DP - D)))
    # Resident codebook variants (all loop-invariant work hoisted out of the
    # kernel body): exact f32 for selection, (2*e)^T bf16 for the distance
    # matmul, ||e||^2 + big bias on padded codes for the argmin.
    et2_bf = (2.0 * e_p).T.astype(jnp.bfloat16)                       # (DP, KP)
    esq = jnp.sum(e_p * e_p, axis=1)
    esq = jnp.where(jnp.arange(KP) < K, esq, 1e30).reshape(1, KP)

    kernel = functools.partial(_vq_kernel, n_valid=N, tile_n=tile_n,
                               inner_tiles=inner_tiles)

    q_p, enc_p, sse_part, cnt_part = pl.pallas_call(
        kernel,
        out_shape=(
            jax.ShapeDtypeStruct((NP, DP), jnp.float32),       # quantized (flat, padded)
            jax.ShapeDtypeStruct((NP, KP), jnp.bfloat16),      # one-hot encodings
            jax.ShapeDtypeStruct((num_outer, DP), jnp.float32),  # per-half SSE lane partials
            jax.ShapeDtypeStruct((num_outer, KP), jnp.float32),  # per-half code counts
        ),
        grid_spec=pltpu.PrefetchScalarGridSpec(
            num_scalar_prefetch=0,
            grid=(num_outer, inner_tiles),
            in_specs=[
                pl.BlockSpec((tile_n, DP), lambda i, j: (i * inner_tiles + j, 0)),
                pl.BlockSpec((DP, KP), lambda i, j: (0, 0)),   # (2*e)^T bf16, resident
                pl.BlockSpec((KP, DP), lambda i, j: (0, 0)),   # e f32, resident
                pl.BlockSpec((1, KP), lambda i, j: (0, 0)),    # ||e||^2 + bias, resident
            ],
            out_specs=(
                pl.BlockSpec((tile_n, DP), lambda i, j: (i * inner_tiles + j, 0)),
                pl.BlockSpec((tile_n, KP), lambda i, j: (i * inner_tiles + j, 0)),
                pl.BlockSpec((1, DP), lambda i, j: (i, 0)),
                pl.BlockSpec((1, KP), lambda i, j: (i, 0)),
            ),
            scratch_shapes=[
                pltpu.VMEM((1, DP), jnp.float32),   # per-lane SSE accumulator
                pltpu.VMEM((1, KP), jnp.float32),   # per-code count accumulator
            ],
        ),
        compiler_params=pltpu.CompilerParams(
            dimension_semantics=("parallel", "arbitrary"),
            vmem_limit_bytes=vmem_limit,
        ),
    )(flat_p, et2_bf, e_p, esq)

    # Finalize tiny reductions in the wrapper (merges per-core partials).
    sse = jnp.sum(sse_part)                                  # padded cols add 0
    loss = (commitment_cost / float(N * D)) * sse
    counts = jnp.sum(cnt_part, axis=0)[:K]
    avg_probs = counts / float(N)
    perplexity = jnp.exp(-jnp.sum(avg_probs * jnp.log(avg_probs + 1e-10)))

    quantized = jnp.transpose(q_p[:N, :D].reshape(B, H, W, C), (0, 3, 1, 2))
    encodings = enc_p[:N, :K].astype(jnp.float32)
    return loss, quantized, perplexity, encodings


if __name__ == "__main__":
    # Module hyperparameters (deterministic, in-script)
    num_embeddings = 16
    embedding_dim = 4
    commitment_cost = 0.25

    key = jax.random.PRNGKey(0)
    k_x, k_e = jax.random.split(key)

    # Inputs: NCHW, batch=2, channels=embedding_dim=4, spatial=16
    x = jax.random.normal(k_x, (2, 4, 16, 16), dtype=jnp.float32)
    embedding = jax.random.normal(k_e, (num_embeddings, embedding_dim),
                                  dtype=jnp.float32)

    loss, quantized, perplexity, encodings = vector_quantizer_ema_forward(
        x, embedding, commitment_cost)
    jax.block_until_ready((loss, quantized, perplexity, encodings))

    # Shapes match the PyTorch reference forward.
    assert quantized.shape == x.shape
    assert encodings.shape == (2 * 16 * 16, num_embeddings)
    assert loss.shape == () and perplexity.shape == ()

    # Every row of encodings is one-hot.
    assert bool(jnp.all(jnp.sum(encodings, axis=1) == 1.0))

    # Cross-check against a pure-JAX f32 reference of the PyTorch forward.
    # (bf16 distance matmul may flip near-exact ties, hence loose tolerances.)
    flat = jnp.transpose(x, (0, 2, 3, 1)).reshape(-1, embedding_dim)
    dist = (jnp.sum(flat ** 2, 1, keepdims=True) + jnp.sum(embedding ** 2, 1)
            - 2.0 * flat @ embedding.T)
    ref_idx = jnp.argmin(dist, axis=1)
    got_idx = jnp.argmax(encodings, axis=1)
    assert bool(jnp.mean((ref_idx == got_idx).astype(jnp.float32)) > 0.95)
    ref_loss = commitment_cost * jnp.mean((embedding[ref_idx] - flat) ** 2)
    assert bool(jnp.abs(ref_loss - loss) < 1e-3 + 5e-2 * jnp.abs(ref_loss))

    print("KERNEL_OK")
</pallas_src>

<mosaic_0001>
module attributes {stable_mosaic.version = 11 : i64} {
  func.func @_vq_kernel(%arg0: i32, %arg1: i32, %arg2: memref<512x128xf32, #tpu.memory_space<vmem>>, %arg3: memref<128x128xbf16, #tpu.memory_space<vmem>>, %arg4: memref<128x128xf32, #tpu.memory_space<vmem>>, %arg5: memref<1x128xf32, #tpu.memory_space<vmem>>, %arg6: memref<512x128xf32, #tpu.memory_space<vmem>>, %arg7: memref<512x128xbf16, #tpu.memory_space<vmem>>, %arg8: memref<1x128xf32, #tpu.memory_space<vmem>>, %arg9: memref<1x128xf32, #tpu.memory_space<vmem>>, %arg10: memref<1x128xf32, #tpu.memory_space<vmem>>, %arg11: memref<1x128xf32, #tpu.memory_space<vmem>>) attributes {dimension_semantics = [#tpu.dimension_semantics<parallel>, #tpu.dimension_semantics<arbitrary>], iteration_bounds = array<i64: 1, 1>, scalar_prefetch = 0 : i64, scratch_operands = 2 : i64, tpu.core_type = #tpu.core_type<tc>, window_params = [{transform_indices = @transform_0, window_bounds = array<i64: 512, 128>}, {pipeline_mode = #tpu.pipeline_mode<synchronous>, transform_indices = @transform_1, window_bounds = array<i64: 128, 128>}, {pipeline_mode = #tpu.pipeline_mode<synchronous>, transform_indices = @transform_2, window_bounds = array<i64: 128, 128>}, {pipeline_mode = #tpu.pipeline_mode<synchronous>, transform_indices = @transform_3, window_bounds = array<i64: 1, 128>}, {transform_indices = @transform_4, window_bounds = array<i64: 512, 128>}, {transform_indices = @transform_5, window_bounds = array<i64: 512, 128>}, {transform_indices = @transform_6, window_bounds = array<i64: 1, 128>}, {transform_indices = @transform_7, window_bounds = array<i64: 1, 128>}]} {
    %c0_i32 = arith.constant 0 : i32
    %0 = arith.cmpi eq, %arg1, %c0_i32 : i32
    %1 = arith.extui %0 : i1 to i32
    %c0_i32_0 = arith.constant 0 : i32
    %2 = arith.cmpi ne, %1, %c0_i32_0 : i32
    scf.if %2 {
      %cst_21 = arith.constant 0.000000e+00 : f32
      %38 = vector.broadcast %cst_21 : f32 to vector<1x128xf32>
      %c0_22 = arith.constant 0 : index
      %c0_23 = arith.constant 0 : index
      %39 = vector.load %arg10[%c0_22, %c0_23] : memref<1x128xf32, #tpu.memory_space<vmem>>, vector<1x128xf32>
      tpu.vector_store %arg10[%c0_22, %c0_23], %38 {strides = array<i32>} : memref<1x128xf32, #tpu.memory_space<vmem>>, vector<1x128xf32>,
      %cst_24 = arith.constant 0.000000e+00 : f32
      %40 = vector.broadcast %cst_24 : f32 to vector<1x128xf32>
      %c0_25 = arith.constant 0 : index
      %c0_26 = arith.constant 0 : index
      %41 = vector.load %arg11[%c0_25, %c0_26] : memref<1x128xf32, #tpu.memory_space<vmem>>, vector<1x128xf32>
      tpu.vector_store %arg11[%c0_25, %c0_26], %40 {strides = array<i32>} : memref<1x128xf32, #tpu.memory_space<vmem>>, vector<1x128xf32>,
    } else {
    }
    %c0 = arith.constant 0 : index
    %c0_1 = arith.constant 0 : index
    %3 = vector.load %arg2[%c0, %c0_1] : memref<512x128xf32, #tpu.memory_space<vmem>>, vector<512x128xf32>
    %4 = arith.truncf %3 : vector<512x128xf32> to vector<512x128xbf16>
    %c0_2 = arith.constant 0 : index
    %c0_3 = arith.constant 0 : index
    %5 = vector.load %arg3[%c0_2, %c0_3] : memref<128x128xbf16, #tpu.memory_space<vmem>>, vector<128x128xbf16>
    %cst = arith.constant dense<0.000000e+00> : vector<512x128xf32>
    %6 = tpu.matmul %4, %5, %cst {dimension_numbers = #tpu.dot_dimension_numbers<[1], [0], [0], [1], [0, 0, 1, 1], [], []>} : vector<512x128xbf16>, vector<128x128xbf16>, vector<512x128xf32> -> vector<512x128xf32>
    %c0_4 = arith.constant 0 : index
    %c0_5 = arith.constant 0 : index
    %7 = vector.load %arg5[%c0_4, %c0_5] : memref<1x128xf32, #tpu.memory_space<vmem>>, vector<1x128xf32>
    %8 = vector.broadcast %7 : vector<1x128xf32> to vector<512x128xf32>
    %9 = arith.subf %8, %6 : vector<512x128xf32>
    %10 = tpu.reduce_index %9 {axis = 1 : i32, kind = #tpu.reduction_kind<arg_min>} : vector<512x128xf32> -> vector<512xi32>
    %11 = tpu.iota {dimensions = array<i32: 1>} : vector<512x128xi32>
    %12 = vector.shape_cast %10 : vector<512xi32> to vector<512x1xi32>
    %13 = vector.broadcast %12 : vector<512x1xi32> to vector<512x128xi32>
    %14 = arith.cmpi eq, %11, %13 : vector<512x128xi32>
    %15 = arith.extui %14 : vector<512x128xi1> to vector<512x128xi32>
    %16 = arith.sitofp %15 : vector<512x128xi32> to vector<512x128xf32>
    %17 = arith.truncf %16 : vector<512x128xf32> to vector<512x128xbf16>
    %c0_6 = arith.constant 0 : index
    %c0_7 = arith.constant 0 : index
    %18 = vector.load %arg7[%c0_6, %c0_7] : memref<512x128xbf16, #tpu.memory_space<vmem>>, vector<512x128xbf16>
    tpu.vector_store %arg7[%c0_6, %c0_7], %17 {strides = array<i32>} : memref<512x128xbf16, #tpu.memory_space<vmem>>, vector<512x128xbf16>,
    %c0_8 = arith.constant 0 : index
    %c0_9 = arith.constant 0 : index
    %19 = vector.load %arg4[%c0_8, %c0_9] : memref<128x128xf32, #tpu.memory_space<vmem>>, vector<128x128xf32>
    %cst_10 = arith.constant dense<0.000000e+00> : vector<512x128xf32>
    %20 = tpu.matmul %16, %19, %cst_10 {dimension_numbers = #tpu.dot_dimension_numbers<[1], [0], [0], [1], [0, 0, 1, 1], [], []>} : vector<512x128xf32>, vector<128x128xf32>, vector<512x128xf32> -> vector<512x128xf32>
    %c0_11 = arith.constant 0 : index
    %c0_12 = arith.constant 0 : index
    %21 = vector.load %arg6[%c0_11, %c0_12] : memref<512x128xf32, #tpu.memory_space<vmem>>, vector<512x128xf32>
    tpu.vector_store %arg6[%c0_11, %c0_12], %20 {strides = array<i32>} : memref<512x128xf32, #tpu.memory_space<vmem>>, vector<512x128xf32>,
    %22 = arith.subf %20, %3 : vector<512x128xf32>
    %23 = arith.mulf %22, %22 : vector<512x128xf32>
    %c1_i32 = arith.constant 1 : i32
    %24 = arith.muli %arg0, %c1_i32 : i32
    %25 = arith.addi %24, %arg1 : i32
    %c512_i32 = arith.constant 512 : i32
    %26 = arith.muli %25, %c512_i32 : i32
    %c512_i32_13 = arith.constant 512 : i32
    %27 = arith.addi %26, %c512_i32_13 : i32
    %c512_i32_14 = arith.constant 512 : i32
    %28 = arith.cmpi sle, %27, %c512_i32_14 : i32
    %29 = arith.extui %28 : i1 to i32
    %c0_i32_15 = arith.constant 0 : i32
    %30 = arith.cmpi ne, %29, %c0_i32_15 : i32
    scf.if %30 {
      %c0_21 = arith.constant 0 : index
      %c0_22 = arith.constant 0 : index
      %38 = vector.load %arg10[%c0_21, %c0_22] : memref<1x128xf32, #tpu.memory_space<vmem>>, vector<1x128xf32>
      %cst_23 = arith.constant dense<0.000000e+00> : vector<128xf32>
      %39 = vector.multi_reduction <add>, %23, %cst_23 [0] : vector<512x128xf32> to vector<128xf32>
      %40 = vector.shape_cast %39 : vector<128xf32> to vector<1x128xf32>
      %41 = arith.addf %38, %40 : vector<1x128xf32>
      %c0_24 = arith.constant 0 : index
      %c0_25 = arith.constant 0 : index
      %42 = vector.load %arg10[%c0_24, %c0_25] : memref<1x128xf32, #tpu.memory_space<vmem>>, vector<1x128xf32>
      tpu.vector_store %arg10[%c0_24, %c0_25], %41 {strides = array<i32>} : memref<1x128xf32, #tpu.memory_space<vmem>>, vector<1x128xf32>,
      %c0_26 = arith.constant 0 : index
      %c0_27 = arith.constant 0 : index
      %43 = vector.load %arg11[%c0_26, %c0_27] : memref<1x128xf32, #tpu.memory_space<vmem>>, vector<1x128xf32>
      %cst_28 = arith.constant dense<0.000000e+00> : vector<128xf32>
      %44 = vector.multi_reduction <add>, %16, %cst_28 [0] : vector<512x128xf32> to vector<128xf32>
      %45 = vector.shape_cast %44 : vector<128xf32> to vector<1x128xf32>
      %46 = arith.addf %43, %45 : vector<1x128xf32>
      %c0_29 = arith.constant 0 : index
      %c0_30 = arith.constant 0 : index
      %47 = vector.load %arg11[%c0_29, %c0_30] : memref<1x128xf32, #tpu.memory_space<vmem>>, vector<1x128xf32>
      tpu.vector_store %arg11[%c0_29, %c0_30], %46 {strides = array<i32>} : memref<1x128xf32, #tpu.memory_space<vmem>>, vector<1x128xf32>,
    } else {
    }
    %c512_i32_16 = arith.constant 512 : i32
    %31 = arith.addi %26, %c512_i32_16 : i32
    %c512_i32_17 = arith.constant 512 : i32
    %32 = arith.cmpi sgt, %31, %c512_i32_17 : i32
    %33 = arith.extui %32 : i1 to i32
    %c0_i32_18 = arith.constant 0 : i32
    %34 = arith.cmpi ne, %33, %c0_i32_18 : i32
    scf.if %34 {
      %38 = tpu.iota {dimensions = array<i32: 0>} : vector<512x1xi32>
      %39 = vector.broadcast %26 : i32 to vector<512x1xi32>
      %40 = arith.addi %39, %38 : vector<512x1xi32>
      %c512_i32_21 = arith.constant 512 : i32
      %41 = vector.broadcast %c512_i32_21 : i32 to vector<512x1xi32>
      %42 = arith.cmpi slt, %40, %41 : vector<512x1xi32>
      %43 = arith.extui %42 : vector<512x1xi1> to vector<512x1xi32>
      %44 = arith.sitofp %43 : vector<512x1xi32> to vector<512x1xf32>
      %c0_22 = arith.constant 0 : index
      %c0_23 = arith.constant 0 : index
      %45 = vector.load %arg10[%c0_22, %c0_23] : memref<1x128xf32, #tpu.memory_space<vmem>>, vector<1x128xf32>
      %46 = vector.broadcast %44 : vector<512x1xf32> to vector<512x128xf32>
      %47 = arith.mulf %46, %23 : vector<512x128xf32>
      %cst_24 = arith.constant dense<0.000000e+00> : vector<128xf32>
      %48 = vector.multi_reduction <add>, %47, %cst_24 [0] : vector<512x128xf32> to vector<128xf32>
      %49 = vector.shape_cast %48 : vector<128xf32> to vector<1x128xf32>
      %50 = arith.addf %45, %49 : vector<1x128xf32>
      %c0_25 = arith.constant 0 : index
      %c0_26 = arith.constant 0 : index
      %51 = vector.load %arg10[%c0_25, %c0_26] : memref<1x128xf32, #tpu.memory_space<vmem>>, vector<1x128xf32>
      tpu.vector_store %arg10[%c0_25, %c0_26], %50 {strides = array<i32>} : memref<1x128xf32, #tpu.memory_space<vmem>>, vector<1x128xf32>,
      %c0_27 = arith.constant 0 : index
      %c0_28 = arith.constant 0 : index
      %52 = vector.load %arg11[%c0_27, %c0_28] : memref<1x128xf32, #tpu.memory_space<vmem>>, vector<1x128xf32>
      %53 = vector.broadcast %44 : vector<512x1xf32> to vector<512x128xf32>
      %54 = arith.mulf %53, %16 : vector<512x128xf32>
      %cst_29 = arith.constant dense<0.000000e+00> : vector<128xf32>
      %55 = vector.multi_reduction <add>, %54, %cst_29 [0] : vector<512x128xf32> to vector<128xf32>
      %56 = vector.shape_cast %55 : vector<128xf32> to vector<1x128xf32>
      %57 = arith.addf %52, %56 : vector<1x128xf32>
      %c0_30 = arith.constant 0 : index
      %c0_31 = arith.constant 0 : index
      %58 = vector.load %arg11[%c0_30, %c0_31] : memref<1x128xf32, #tpu.memory_space<vmem>>, vector<1x128xf32>
      tpu.vector_store %arg11[%c0_30, %c0_31], %57 {strides = array<i32>} : memref<1x128xf32, #tpu.memory_space<vmem>>, vector<1x128xf32>,
    } else {
    }
    %c0_i32_19 = arith.constant 0 : i32
    %35 = arith.cmpi eq, %arg1, %c0_i32_19 : i32
    %36 = arith.extui %35 : i1 to i32
    %c0_i32_20 = arith.constant 0 : i32
    %37 = arith.cmpi ne, %36, %c0_i32_20 : i32
    scf.if %37 {
      %c0_21 = arith.constant 0 : index
      %c0_22 = arith.constant 0 : index
      %38 = vector.load %arg10[%c0_21, %c0_22] : memref<1x128xf32, #tpu.memory_space<vmem>>, vector<1x128xf32>
      %c0_23 = arith.constant 0 : index
      %c0_24 = arith.constant 0 : index
      %39 = vector.load %arg8[%c0_23, %c0_24] : memref<1x128xf32, #tpu.memory_space<vmem>>, vector<1x128xf32>
      tpu.vector_store %arg8[%c0_23, %c0_24], %38 {strides = array<i32>} : memref<1x128xf32, #tpu.memory_space<vmem>>, vector<1x128xf32>,
      %c0_25 = arith.constant 0 : index
      %c0_26 = arith.constant 0 : index
      %40 = vector.load %arg11[%c0_25, %c0_26] : memref<1x128xf32, #tpu.memory_space<vmem>>, vector<1x128xf32>
      %c0_27 = arith.constant 0 : index
      %c0_28 = arith.constant 0 : index
      %41 = vector.load %arg9[%c0_27, %c0_28] : memref<1x128xf32, #tpu.memory_space<vmem>>, vector<1x128xf32>
      tpu.vector_store %arg9[%c0_27, %c0_28], %40 {strides = array<i32>} : memref<1x128xf32, #tpu.memory_space<vmem>>, vector<1x128xf32>,
    } else {
    }
    return
  }
  func.func @transform_0(%arg0: i32, %arg1: i32) -> (i32, i32) {
    %c1_i32 = arith.constant 1 : i32
    %0 = arith.muli %arg0, %c1_i32 : i32
    %1 = arith.addi %0, %arg1 : i32
    %c0_i32 = arith.constant 0 : i32
    %c0_i32_0 = arith.constant 0 : i32
    return %1, %c0_i32 : i32, i32
  }
  func.func @transform_1(%arg0: i32, %arg1: i32) -> (i32, i32) {
    %c0_i32 = arith.constant 0 : i32
    %c0_i32_0 = arith.constant 0 : i32
    %c0_i32_1 = arith.constant 0 : i32
    return %c0_i32, %c0_i32_0 : i32, i32
  }
  func.func @transform_2(%arg0: i32, %arg1: i32) -> (i32, i32) {
    %c0_i32 = arith.constant 0 : i32
    %c0_i32_0 = arith.constant 0 : i32
    %c0_i32_1 = arith.constant 0 : i32
    return %c0_i32, %c0_i32_0 : i32, i32
  }
  func.func @transform_3(%arg0: i32, %arg1: i32) -> (i32, i32) {
    %c0_i32 = arith.constant 0 : i32
    %c0_i32_0 = arith.constant 0 : i32
    %c0_i32_1 = arith.constant 0 : i32
    return %c0_i32, %c0_i32_0 : i32, i32
  }
  func.func @transform_4(%arg0: i32, %arg1: i32) -> (i32, i32) {
    %c1_i32 = arith.constant 1 : i32
    %0 = arith.muli %arg0, %c1_i32 : i32
    %1 = arith.addi %0, %arg1 : i32
    %c0_i32 = arith.constant 0 : i32
    %c0_i32_0 = arith.constant 0 : i32
    return %1, %c0_i32 : i32, i32
  }
  func.func @transform_5(%arg0: i32, %arg1: i32) -> (i32, i32) {
    %c1_i32 = arith.constant 1 : i32
    %0 = arith.muli %arg0, %c1_i32 : i32
    %1 = arith.addi %0, %arg1 : i32
    %c0_i32 = arith.constant 0 : i32
    %c0_i32_0 = arith.constant 0 : i32
    return %1, %c0_i32 : i32, i32
  }
  func.func @transform_6(%arg0: i32, %arg1: i32) -> (i32, i32) {
    %c0_i32 = arith.constant 0 : i32
    %c0_i32_0 = arith.constant 0 : i32
    return %arg0, %c0_i32 : i32, i32
  }
  func.func @transform_7(%arg0: i32, %arg1: i32) -> (i32, i32) {
    %c0_i32 = arith.constant 0 : i32
    %c0_i32_0 = arith.constant 0 : i32
    return %arg0, %c0_i32 : i32, i32
  }
}

</mosaic_0001>

<bundles_post_ra>
// kernel: tpu_custom_call.1
= control target key start
LH: loop header
LB: loop body
LE: loop exit
PB: predicated region body
PF: predicated region fallthrough
CT: control target
= control target key end

     0   :  { %13 = vsyncpa [#allocation5], 0  ;;  %s3555_s0 = inlined_call_operand.hbm [shape: f32[512,128], index: 0, kind: input, shape index: {}]   ;;  %s3556_s1 = inlined_call_operand.hbm [shape: bf16[128,128], index: 1, kind: input, shape index: {}]   ;;  %s3557_s2 = inlined_call_operand.hbm [shape: f32[128,128], index: 2, kind: input, shape index: {}]   ;;  %s3558_s3 = inlined_call_operand.vmem [shape: f32[1,128], index: 3, kind: input, shape index: {}]   ;;  %s3559_s4 = inlined_call_operand.hbm [shape: f32[512,128], index: 4, kind: output, shape index: {0}]   ;;  %s3560_s5 = inlined_call_operand.hbm [shape: bf16[512,128], index: 5, kind: output, shape index: {1}]   ;;  %s3561_s6 = inlined_call_operand.hbm [shape: f32[1,128], index: 6, kind: output, shape index: {2}]   ;;  %s3562_s7 = inlined_call_operand.hbm [shape: f32[1,128], index: 7, kind: output, shape index: {3}]  }
   0x1   :  { %14 = vsyncpa [#allocation8], 0 }
   0x2   :  { %15 = vsyncpa [#allocation6], 0 }
   0x3   :  { %16 = vsyncpa [#allocation12], 0  ;;  %s39_s26 = sshll.u32 %s3556_s1, 4  ;;  %s40_s26 = int_to_ptr.hbm [resolvable:$true] %s39_s26 }
   0x4   :  { %17 = vsyncpa [#allocation15], 0  ;;  %s2759_s27 = smov [#allocation7]   ;;  %s26_s8 = sshll.u32 %s3555_s0, 4  ;;  %s27_s8 = int_to_ptr.hbm [resolvable:$true] %s26_s8 }
   0x5   :  { %s41_s28 = sshll.u32 %s2759_s27, 4  ;;  %s2760_s9 = smov 64   ;;  %s42_s28 = int_to_ptr.vmem [resolvable:$true] %s41_s28 }
   0x6   :  { %s2761_s10 = smov 4   ;;  %s2762_s11 = smov [#allocation4]  }
   0x7   :  { %47 = dma.hbm_to_vmem [thread:$0]  %s40_s26, 1024, %s42_s28, [#allocation8], %s2760_s9, %s2760_s9, %s2761_s10  }
   0x8   :  { %s28_s12 = sshll.u32 %s2762_s11, 4  ;;  %s2763_s1 = smov 128   ;;  %s29_s12 = int_to_ptr.vmem [resolvable:$true] %s28_s12 }
   0x9   :  { %s2764_s13 = smov 8   ;;  %s52_s0 = sshll.u32 %s3557_s2, 4  ;;  %s53_s0 = int_to_ptr.hbm [resolvable:$true] %s52_s0 }
   0xa   :  { %34 = dma.hbm_to_vmem [thread:$0]  %s27_s8, 8192, %s29_s12, [#allocation5], %s2763_s1, %s2763_s1, %s2764_s13  }
   0xb   :  { %s2765_s16 = smov [#allocation9]  }
   0xc   :  { %s54_s17 = sshll.u32 %s2765_s16, 4  ;;  %s55_s17 = int_to_ptr.vmem [resolvable:$true] %s54_s17 }
   0xd   :  { %60 = dma.hbm_to_vmem [thread:$0]  %s53_s0, 2048, %s55_s17, [#allocation8], %s2763_s1, %s2763_s1, %s2764_s13  }
   0xe   :  { %2749 = dma.done.wait [#allocation5], 8192  }
   0xf   :  { %2750 = vsyncadd [#allocation5], 4294959104 }
  0x10   :  { %2751 = dma.done.wait [#allocation8], 3072  }
  0x11   :  { %2752 = vsyncadd [#allocation8], 4294964224  ;;  %v2351_v0 = vld [vmem:[#allocation7 + $0x38] sm:$0xff]  ;;  %v2350_v1 = vld [vmem:[#allocation7 + $0x30] sm:$0xff]  ;;  %s2134_s20 = sshll.u32 %s3560_s5, 4  ;;  %s2768_s21 = smov [#allocation11]   ;;  %s2135_s20 = int_to_ptr.hbm [resolvable:$true] %s2134_s20 }
  0x12   :  { %247 = vmatpush.bf16.msra.mxu0 %v2351_v0  ;;  %2479 = vmatpush.bf16.msra.mxu2 %v2351_v0  ;;  %v2349_v2 = vld [vmem:[#allocation7 + $0x28] sm:$0xff]  ;;  %v2348_v3 = vld [vmem:[#allocation7 + $0x20] sm:$0xff]  ;;  %v2347_v4 = vld [vmem:[#allocation7 + $0x18] sm:$0xff]  ;;  %s2132_s22 = sshll.u32 %s2768_s21, 4  ;;  %s2769_s23 = smov [#allocation14]   ;;  %s2133_s22 = int_to_ptr.vmem [resolvable:$true] %s2132_s22 }
  0x13   :  { %v2346_v5 = vld [vmem:[#allocation7 + $0x10] sm:$0xff]  ;;  %v2345_v6 = vld [vmem:[#allocation7 + $0x8] sm:$0xff]  ;;  %v2344_v7 = vld [vmem:[#allocation7] sm:$0xff]  ;;  %s2157_s5 = sshll.u32 %s2769_s23, 4  ;;  %s2159_s26 = sshll.u32 %s3562_s7, 4  ;;  %s2158_s5 = int_to_ptr.vmem [resolvable:$true] %s2157_s5  ;;  %s2160_s26 = int_to_ptr.hbm [resolvable:$true] %s2159_s26 }
  0x14   :  { %v87_v8 = vld [vmem:[#allocation4] sm:$0xff]  ;;  %v88_v9 = vld [vmem:[#allocation4 + $0x8] sm:$0xff]  ;;  %v89_v14 = vld [vmem:[#allocation4 + $0x10] sm:$0xff]  ;;  %s2770_s7 = smov [#allocation10]   ;;  %s2117_s30 = sshll.u32 %s3559_s4, 4  ;;  %s2118_s30 = int_to_ptr.hbm [resolvable:$true] %s2117_s30 }
  0x15   :  { %v151_v10 = vpack.c.bf16 %v88_v9, %v87_v8  ;;  %v119_v11 = vld [vmem:[#allocation4 + $0x100] sm:$0xff]  ;;  %v120_v12 = vld [vmem:[#allocation4 + $0x108] sm:$0xff]  ;;  %v90_v15 = vld [vmem:[#allocation4 + $0x18] sm:$0xff]  ;;  %s2115_s27 = sshll.u32 %s2770_s7, 4  ;;  %s2771_s4 = smov [#allocation13]   ;;  %s2116_s27 = int_to_ptr.vmem [resolvable:$true] %s2115_s27 }
  0x16   :  { %248 = vmatpush.bf16.msra.mxu0 %v2350_v1  ;;  %2480 = vmatpush.bf16.msra.mxu2 %v2350_v1  ;;  %v167_v13 = vpack.c.bf16 %v120_v12, %v119_v11  ;;  %v152_v16 = vpack.c.bf16 %v90_v15, %v89_v14  ;;  %v121_v17 = vld [vmem:[#allocation4 + $0x110] sm:$0xff]  ;;  %v122_v18 = vld [vmem:[#allocation4 + $0x118] sm:$0xff]  ;;  %v91_v20 = vld [vmem:[#allocation4 + $0x20] sm:$0xff]  ;;  %s2146_s8 = sshll.u32 %s2771_s4, 4  ;;  %s2148_s11 = sshll.u32 %s3561_s6, 4  ;;  %s2147_s8 = int_to_ptr.vmem [resolvable:$true] %s2146_s8  ;;  %s2149_s11 = int_to_ptr.hbm [resolvable:$true] %s2148_s11 }
  0x17   :  { %v168_v19 = vpack.c.bf16 %v122_v18, %v121_v17  ;;  %v92_v21 = vld [vmem:[#allocation4 + $0x28] sm:$0xff]  ;;  %v123_v23 = vld [vmem:[#allocation4 + $0x120] sm:$0xff]  ;;  %v93_v26 = vld [vmem:[#allocation4 + $0x30] sm:$0xff] }
  0x18   :  { %v153_v22 = vpack.c.bf16 %v92_v21, %v91_v20  ;;  %v124_v24 = vld [vmem:[#allocation4 + $0x128] sm:$0xff]  ;;  %v94_v27 = vld [vmem:[#allocation4 + $0x38] sm:$0xff]  ;;  %v125_v29 = vld [vmem:[#allocation4 + $0x130] sm:$0xff] }
  0x19   :  { %v169_v25 = vpack.c.bf16 %v124_v24, %v123_v23  ;;  %v154_v28 = vpack.c.bf16 %v94_v27, %v93_v26  ;;  %v126_v30 = vld [vmem:[#allocation4 + $0x138] sm:$0xff]  ;;  %v95_v32 = vld [vmem:[#allocation4 + $0x40] sm:$0xff]  ;;  %v96_v33 = vld [vmem:[#allocation4 + $0x48] sm:$0xff] }
  0x1a   :  { %249 = vmatpush.bf16.msra.mxu0 %v2349_v2  ;;  %2481 = vmatpush.bf16.msra.mxu2 %v2349_v2  ;;  %v170_v31 = vpack.c.bf16 %v126_v30, %v125_v29  ;;  %v155_v34 = vpack.c.bf16 %v96_v33, %v95_v32  ;;  %v127_v35 = vld [vmem:[#allocation4 + $0x140] sm:$0xff]  ;;  %v128_v36 = vld [vmem:[#allocation4 + $0x148] sm:$0xff]  ;;  %v97_v38 = vld [vmem:[#allocation4 + $0x50] sm:$0xff] }
  0x1b   :  { %v171_v37 = vpack.c.bf16 %v128_v36, %v127_v35  ;;  %v98_v39 = vld [vmem:[#allocation4 + $0x58] sm:$0xff]  ;;  %v129_v41 = vld [vmem:[#allocation4 + $0x150] sm:$0xff]  ;;  %v99_v44 = vld [vmem:[#allocation4 + $0x60] sm:$0xff] }
  0x1c   :  { %v156_v40 = vpack.c.bf16 %v98_v39, %v97_v38  ;;  %v130_v42 = vld [vmem:[#allocation4 + $0x158] sm:$0xff]  ;;  %v100_v45 = vld [vmem:[#allocation4 + $0x68] sm:$0xff]  ;;  %v131_v47 = vld [vmem:[#allocation4 + $0x160] sm:$0xff] }
  0x1d   :  { %v172_v43 = vpack.c.bf16 %v130_v42, %v129_v41  ;;  %v157_v46 = vpack.c.bf16 %v100_v45, %v99_v44  ;;  %v132_v48 = vld [vmem:[#allocation4 + $0x168] sm:$0xff]  ;;  %v101_v49 = vld [vmem:[#allocation4 + $0x70] sm:$0xff]  ;;  %v102_v50 = vld [vmem:[#allocation4 + $0x78] sm:$0xff] }
  0x1e   :  { %250 = vmatpush.bf16.msra.mxu0 %v2348_v3  ;;  %2482 = vmatpush.bf16.msra.mxu2 %v2348_v3  ;;  %v173_v51 = vpack.c.bf16 %v132_v48, %v131_v47  ;;  %v158_v52 = vpack.c.bf16 %v102_v50, %v101_v49  ;;  %v133_v53 = vld [vmem:[#allocation4 + $0x170] sm:$0xff]  ;;  %v134_v54 = vld [vmem:[#allocation4 + $0x178] sm:$0xff]  ;;  %v103_v55 = vld [vmem:[#allocation4 + $0x80] sm:$0xff] }
  0x1f   :  { %v104_v56 = vld [vmem:[#allocation4 + $0x88] sm:$0xff]  ;;  %v174_v57 = vpack.c.bf16 %v134_v54, %v133_v53  ;;  %v2833_v58 = vld [vmem:[%s3558_s3] ss:$0 sm:$0xff]  ;;  %v135_v0 = vld [vmem:[#allocation4 + $0x180] sm:$0xff] }
  0x20   :  { %v159_v59 = vpack.c.bf16 %v104_v56, %v103_v55  ;;  %v136_v1 = vld [vmem:[#allocation4 + $0x188] sm:$0xff]  ;;  %v105_v2 = vld [vmem:[#allocation4 + $0x90] sm:$0xff]  ;;  %v106_v3 = vld [vmem:[#allocation4 + $0x98] sm:$0xff] }
  0x21   :  { %v137_v12 = vld [vmem:[#allocation4 + $0x190] sm:$0xff]  ;;  %v107_v14 = vld [vmem:[#allocation4 + $0xa0] sm:$0xff]  ;;  %v108_v15 = vld [vmem:[#allocation4 + $0xa8] sm:$0xff] }
  0x22   :  { %251 = vmatpush.bf16.msra.mxu0 %v2347_v4  ;;  %2483 = vmatpush.bf16.msra.mxu2 %v2347_v4  ;;  %v175_v4 = vpack.c.bf16 %v136_v1, %v135_v0  ;;  %v161_v17 = vpack.c.bf16 %v108_v15, %v107_v14  ;;  %v109_v24 = vld [vmem:[#allocation4 + $0xb0] sm:$0xff]  ;;  %v139_v26 = vld [vmem:[#allocation4 + $0x1a0] sm:$0xff]  ;;  %v140_v27 = vld [vmem:[#allocation4 + $0x1a8] sm:$0xff] }
  0x23   :  { %v949_v36 = vld [vmem:[#allocation9 + $0x78] sm:$0xff]  ;;  %v948_v38 = vld [vmem:[#allocation9 + $0x70] sm:$0xff]  ;;  %v111_v39 = vld [vmem:[#allocation4 + $0xc0] sm:$0xff] }
  0x24   :  { %950 = vmatpush.msra.mxu1 %v949_v36  ;;  %2487 = vmatpush.msra.mxu3 %v949_v36  ;;  %v947_v41 = vld [vmem:[#allocation9 + $0x68] sm:$0xff]  ;;  %v141_v42 = vld [vmem:[#allocation4 + $0x1b0] sm:$0xff]  ;;  %v946_v45 = vld [vmem:[#allocation9 + $0x60] sm:$0xff] }
  0x25   :  { %v945_v50 = vld [vmem:[#allocation9 + $0x58] sm:$0xff]  ;;  %v943_v53 = vld [vmem:[#allocation9 + $0x48] sm:$0xff]  ;;  %v942_v54 = vld [vmem:[#allocation9 + $0x40] sm:$0xff] }
  0x26   :  { %252 = vmatpush.bf16.msra.mxu0 %v2346_v5  ;;  %2484 = vmatpush.bf16.msra.mxu2 %v2346_v5  ;;  %v160_v5 = vpack.c.bf16 %v106_v3, %v105_v2  ;;  %v939_v0 = vld [vmem:[#allocation9 + $0x28] sm:$0xff]  ;;  %v143_v1 = vld [vmem:[#allocation4 + $0x1c0] sm:$0xff] }
  0x27   :  { %951 = vmatpush.msra.mxu1 %v948_v38  ;;  %2488 = vmatpush.msra.mxu3 %v948_v38  ;;  %v144_v2 = vld [vmem:[#allocation4 + $0x1c8] sm:$0xff]  ;;  %v934_v14 = vld [vmem:[#allocation9] sm:$0xff] }
  0x28   :  { %v179_v3 = vpack.c.bf16 %v144_v2, %v143_v1  ;;  %v148_v36 = vld [vmem:[#allocation4 + $0x1e8] sm:$0xff] }
  0x29   :  { %952 = vmatpush.msra.mxu1 %v947_v41  ;;  %2489 = vmatpush.msra.mxu3 %v947_v41 }
  0x2a   :  { %253 = vmatpush.bf16.msra.mxu0 %v2345_v6  ;;  %2485 = vmatpush.bf16.msra.mxu2 %v2345_v6 }
  0x2b   :  { %953 = vmatpush.msra.mxu1 %v946_v45  ;;  %2490 = vmatpush.msra.mxu3 %v946_v45 }
  0x2d   :  { %954 = vmatpush.msra.mxu1 %v945_v50  ;;  %2491 = vmatpush.msra.mxu3 %v945_v50 }
  0x2e   :  { %254 = vmatpush.bf16.msra.mxu0 %v2344_v7  ;;  %2486 = vmatpush.bf16.msra.mxu2 %v2344_v7 }
  0x31   :  { %255 = vmatmul.bf16.vlgmr.msra.gmra.mxu0 %v151_v10  ;;  %335 = vmatmul.bf16.vlgmr.msra.gmra.mxu2 %v167_v13  ;;  %v138_v13 = vld [vmem:[#allocation4 + $0x198] sm:$0xff] }
  0x41   :  { %260 = vmatmul.bf16.gmra.mxu0 %v152_v16  ;;  %340 = vmatmul.bf16.gmra.mxu2 %v168_v19  ;;  %v176_v16 = vpack.c.bf16 %v138_v13, %v137_v12  ;;  %v935_v12 = vld [vmem:[#allocation9 + $0x8] sm:$0xff]  ;;  %v2766_v13 = vmov 0.0  }
  0x42   :  { %85 = vst [vmem:[#allocation2] sm:$0x1] %v2766_v13 }
  0x43   :  { %86 = vst [vmem:[#allocation3] sm:$0x1] %v2766_v13 }
  0x51   :  { %265 = vmatmul.bf16.gmra.mxu0 %v153_v22  ;;  %345 = vmatmul.bf16.gmra.mxu2 %v169_v25  ;;  %v110_v25 = vld [vmem:[#allocation4 + $0xb8] sm:$0xff] }
  0x52   :  { %v162_v29 = vpack.c.bf16 %v110_v25, %v109_v24 }
  0x61   :  { %270 = vmatmul.bf16.gmra.mxu0 %v154_v28  ;;  %350 = vmatmul.bf16.gmra.mxu2 %v170_v31  ;;  %v177_v28 = vpack.c.bf16 %v140_v27, %v139_v26 }
  0x71   :  { %275 = vmatmul.bf16.gmra.mxu0 %v155_v34  ;;  %355 = vmatmul.bf16.gmra.mxu2 %v171_v37 }
  0x81   :  { %280 = vmatmul.bf16.gmra.mxu0 %v156_v40  ;;  %360 = vmatmul.bf16.gmra.mxu2 %v172_v43  ;;  %v112_v40 = vld [vmem:[#allocation4 + $0xc8] sm:$0xff]  ;;  %v142_v43 = vld [vmem:[#allocation4 + $0x1b8] sm:$0xff] }
  0x82   :  { %v178_v44 = vpack.c.bf16 %v142_v43, %v141_v42 }
  0x91   :  { %285 = vmatmul.bf16.gmra.mxu0 %v157_v46  ;;  %365 = vmatmul.bf16.gmra.mxu2 %v173_v51  ;;  %v163_v46 = vpack.c.bf16 %v112_v40, %v111_v39  ;;  %v612_v39 = vlaneseq }
  0x93   :  { %v2887_v43 = vand.u32 127, %v612_v39 }
  0xa1   :  { %290 = vmatmul.bf16.gmra.mxu0 %v158_v52  ;;  %370 = vmatmul.bf16.gmra.mxu2 %v174_v57  ;;  %v944_v52 = vld [vmem:[#allocation9 + $0x50] sm:$0xff] }
  0xa2   :  { %955 = vmatpush.msra.mxu1 %v944_v52  ;;  %2492 = vmatpush.msra.mxu3 %v944_v52  ;;  %v150_v52 = vld [vmem:[#allocation4 + $0x1f8] sm:$0xff] }
  0xa4   :  { %956 = vmatpush.msra.mxu1 %v943_v53  ;;  %2493 = vmatpush.msra.mxu3 %v943_v53 }
  0xa6   :  { %957 = vmatpush.msra.mxu1 %v942_v54  ;;  %2494 = vmatpush.msra.mxu3 %v942_v54 }
  0xae   :  { %v256_v60 = vpop.f32.mrf.mxu0 }
  0xaf   :  { %v420_v61 = vsub.f32 %v2833_v58, %v256_v60 }
  0xb1   :  { %295 = vmatmul.bf16.gmra.mxu0 %v159_v59  ;;  %484 = vmin.index.xlane.f32.xlu0 %v420_v61  ;;  %v941_v59 = vld [vmem:[#allocation9 + $0x38] sm:$0xff]  ;;  %v940_v61 = vld [vmem:[#allocation9 + $0x30] sm:$0xff] }
  0xb2   :  { %375 = vmatmul.bf16.gmra.mxu2 %v175_v4  ;;  %958 = vmatpush.msra.mxu1 %v941_v59  ;;  %v938_v4 = vld [vmem:[#allocation9 + $0x20] sm:$0xff] }
  0xb3   :  { %2495 = vmatpush.msra.mxu3 %v941_v59 }
  0xb4   :  { %v336_v8 = vpop.f32.mrf.mxu2  ;;  %959 = vmatpush.msra.mxu1 %v940_v61 }
  0xb5   :  { %v452_v31 = vsub.f32 %v2833_v58, %v336_v8  ;;  %2496 = vmatpush.msra.mxu3 %v940_v61 }
  0xb6   :  { %v258_v62 = vpop.f32.mrf.mxu0  ;;  %960 = vmatpush.msra.mxu1 %v939_v0 }
  0xb7   :  { %v421_v63 = vsub.f32 %v2833_v58, %v258_v62  ;;  %v113_v62 = vld [vmem:[#allocation4 + $0xd0] sm:$0xff]  ;;  %2497 = vmatpush.msra.mxu3 %v939_v0 }
  0xb8   :  { %961 = vmatpush.msra.mxu1 %v938_v4 }
  0xb9   :  { %486 = vmin.index.xlane.f32.xlu0 %v421_v63  ;;  %v114_v63 = vld [vmem:[#allocation4 + $0xd8] sm:$0xff]  ;;  %2498 = vmatpush.msra.mxu3 %v938_v4 }
  0xbc   :  { %v2839_v11 = vpop.f32.mrf.mxu2 }
  0xbd   :  { %v453_v49 = vsub.f32 %v2833_v58, %v2839_v11  ;;  %v936_v11 = vld [vmem:[#allocation9 + $0x10] sm:$0xff] }
  0xbe   :  { %v261_v6 = vpop.f32.mrf.mxu0 }
  0xbf   :  { %v422_v7 = vsub.f32 %v2833_v58, %v261_v6 }
  0xc1   :  { %300 = vmatmul.bf16.gmra.mxu0 %v160_v5  ;;  %488 = vmin.index.xlane.f32.xlu1 %v422_v7  ;;  %v164_v5 = vpack.c.bf16 %v114_v63, %v113_v62 }
  0xc2   :  { %380 = vmatmul.bf16.gmra.mxu2 %v176_v16 }
  0xc4   :  { %v2842_v20 = vpop.f32.mrf.mxu2 }
  0xc5   :  { %v454_v55 = vsub.f32 %v2833_v58, %v2842_v20  ;;  %v116_v20 = vld [vmem:[#allocation4 + $0xe8] sm:$0xff] }
  0xc6   :  { %v263_v9 = vpop.f32.mrf.mxu0 }
  0xc7   :  { %v423_v10 = vsub.f32 %v2833_v58, %v263_v9  ;;  %v937_v9 = vld [vmem:[#allocation9 + $0x18] sm:$0xff] }
  0xc8   :  { %962 = vmatpush.msra.mxu1 %v937_v9  ;;  %2499 = vmatpush.msra.mxu3 %v937_v9 }
  0xc9   :  { %490 = vmin.index.xlane.f32.xlu1 %v423_v10 }
  0xca   :  { %963 = vmatpush.msra.mxu1 %v936_v11  ;;  %2500 = vmatpush.msra.mxu3 %v936_v11 }
  0xcc   :  { %v2845_v23 = vpop.f32.mrf.mxu2  ;;  %964 = vmatpush.msra.mxu1 %v935_v12  ;;  %2501 = vmatpush.msra.mxu3 %v935_v12 }
  0xcd   :  { %v455_v8 = vsub.f32 %v2833_v58, %v2845_v23 }
  0xce   :  { %v266_v18 = vpop.f32.mrf.mxu0  ;;  %965 = vmatpush.msra.mxu1 %v934_v14  ;;  %2502 = vmatpush.msra.mxu3 %v934_v14 }
  0xcf   :  { %v424_v19 = vsub.f32 %v2833_v58, %v266_v18 }
  0xd1   :  { %305 = vmatmul.bf16.gmra.mxu0 %v161_v17  ;;  %492 = vmin.index.xlane.f32.xlu2 %v424_v19  ;;  %v115_v19 = vld [vmem:[#allocation4 + $0xe0] sm:$0xff] }
  0xd2   :  { %385 = vmatmul.bf16.gmra.mxu2 %v177_v28  ;;  %v165_v24 = vpack.c.bf16 %v116_v20, %v115_v19 }
  0xd4   :  { %v2849_v33 = vpop.f32.mrf.mxu2 }
  0xd5   :  { %v456_v15 = vsub.f32 %v2833_v58, %v2849_v33  ;;  %v117_v33 = vld [vmem:[#allocation4 + $0xf0] sm:$0xff] }
  0xd6   :  { %v268_v21 = vpop.f32.mrf.mxu0 }
  0xd7   :  { %v425_v22 = vsub.f32 %v2833_v58, %v268_v21  ;;  %v145_v21 = vld [vmem:[#allocation4 + $0x1d0] sm:$0xff] }
  0xd9   :  { %494 = vmin.index.xlane.f32.xlu2 %v425_v22  ;;  %v146_v22 = vld [vmem:[#allocation4 + $0x1d8] sm:$0xff] }
  0xda   :  { %v180_v23 = vpack.c.bf16 %v146_v22, %v145_v21 }
  0xdc   :  { %v2852_v37 = vpop.f32.mrf.mxu2 }
  0xdd   :  { %v457_v27 = vsub.f32 %v2833_v58, %v2852_v37 }
  0xde   :  { %v271_v30 = vpop.f32.mrf.mxu0 }
  0xdf   :  { %v426_v32 = vsub.f32 %v2833_v58, %v271_v30 }
  0xe1   :  { %310 = vmatmul.bf16.gmra.mxu0 %v162_v29  ;;  %496 = vmin.index.xlane.f32.xlu0 %v426_v32 }
  0xe2   :  { %548 = vmin.index.xlane.f32.xlu2 %v452_v31  ;;  %390 = vmatmul.bf16.gmra.mxu2 %v178_v44 }
  0xe4   :  { %v2857_v51 = vpop.f32.mrf.mxu2 }
  0xe5   :  { %v458_v29 = vsub.f32 %v2833_v58, %v2857_v51  ;;  %v149_v51 = vld [vmem:[#allocation4 + $0x1f0] sm:$0xff] }
  0xe6   :  { %v273_v34 = vpop.f32.mrf.mxu0  ;;  %v182_v54 = vpack.c.bf16 %v150_v52, %v149_v51 }
  0xe7   :  { %v427_v35 = vsub.f32 %v2833_v58, %v273_v34  ;;  %v118_v34 = vld [vmem:[#allocation4 + $0xf8] sm:$0xff] }
  0xe8   :  { %v166_v37 = vpack.c.bf16 %v118_v34, %v117_v33 }
  0xe9   :  { %498 = vmin.index.xlane.f32.xlu1 %v427_v35  ;;  %v147_v35 = vld [vmem:[#allocation4 + $0x1e0] sm:$0xff] }
  0xea   :  { %v181_v38 = vpack.c.bf16 %v148_v36, %v147_v35 }
  0xec   :  { %v2862_v60 = vpop.f32.mrf.mxu2 }
  0xed   :  { %v459_v42 = vsub.f32 %v2833_v58, %v2862_v60 }
  0xee   :  { %v276_v47 = vpop.f32.mrf.mxu0 }
  0xef   :  { %v428_v48 = vsub.f32 %v2833_v58, %v276_v47 }
  0xf1   :  { %315 = vmatmul.bf16.gmra.mxu0 %v163_v46  ;;  %550 = vmin.index.xlane.f32.xlu1 %v453_v49 }
  0xf2   :  { %500 = vmin.index.xlane.f32.xlu0 %v428_v48  ;;  %395 = vmatmul.bf16.gmra.mxu2 %v179_v3  ;;  %v2767_v48 = vmov 1.0  }
  0xf4   :  { %v2867_v10 = vpop.f32.mrf.mxu2 }
  0xf5   :  { %v460_v46 = vsub.f32 %v2833_v58, %v2867_v10 }
  0xf6   :  { %v278_v56 = vpop.f32.mrf.mxu0 }
  0xf7   :  { %v429_v57 = vsub.f32 %v2833_v58, %v278_v56 }
  0xf9   :  { %502 = vmin.index.xlane.f32.xlu2 %v429_v57 }
  0xfa   :  { %552 = vmin.index.xlane.f32.xlu0 %v454_v55 }
  0xfc   :  { %v2874_v18 = vpop.f32.mrf.mxu2 }
  0xfd   :  { %v461_v59 = vsub.f32 %v2833_v58, %v2874_v18 }
  0xfe   :  { %v281_v6 = vpop.f32.mrf.mxu0 }
  0xff   :  { %v430_v7 = vsub.f32 %v2833_v58, %v281_v6 }
 0x101   :  { %320 = vmatmul.bf16.gmra.mxu0 %v164_v5  ;;  %554 = vmin.index.xlane.f32.xlu2 %v455_v8 }
 0x102   :  { %504 = vmin.index.xlane.f32.xlu1 %v430_v7  ;;  %400 = vmatmul.bf16.gmra.mxu2 %v180_v23 }
 0x104   :  { %v361_v28 = vpop.f32.mrf.mxu2 }
 0x105   :  { %v462_v1 = vsub.f32 %v2833_v58, %v361_v28 }
 0x106   :  { %v283_v16 = vpop.f32.mrf.mxu0 }
 0x107   :  { %v431_v17 = vsub.f32 %v2833_v58, %v283_v16 }
 0x109   :  { %506 = vmin.index.xlane.f32.xlu0 %v431_v17 }
 0x10a   :  { %556 = vmin.index.xlane.f32.xlu1 %v456_v15 }
 0x10c   :  { %v2882_v32 = vpop.f32.mrf.mxu2 }
 0x10d   :  { %v463_v10 = vsub.f32 %v2833_v58, %v2882_v32 }
 0x10e   :  { %v286_v25 = vpop.f32.mrf.mxu0 }
 0x10f   :  { %v432_v26 = vsub.f32 %v2833_v58, %v286_v25 }
 0x111   :  { %325 = vmatmul.bf16.gmra.mxu0 %v165_v24  ;;  %558 = vmin.index.xlane.f32.xlu0 %v457_v27 }
 0x112   :  { %508 = vmin.index.xlane.f32.xlu2 %v432_v26  ;;  %405 = vmatmul.bf16.gmra.mxu2 %v181_v38 }
 0x114   :  { %v366_v44 = vpop.f32.mrf.mxu2 }
 0x115   :  { %v464_v17 = vsub.f32 %v2833_v58, %v366_v44 }
 0x116   :  { %v288_v30 = vpop.f32.mrf.mxu0 }
 0x117   :  { %v433_v31 = vsub.f32 %v2833_v58, %v288_v30 }
 0x119   :  { %510 = vmin.index.xlane.f32.xlu1 %v433_v31 }
 0x11a   :  { %560 = vmin.index.xlane.f32.xlu2 %v458_v29 }
 0x11c   :  { %v2894_v50 = vpop.f32.mrf.mxu2 }
 0x11d   :  { %v465_v26 = vsub.f32 %v2833_v58, %v2894_v50 }
 0x11e   :  { %v291_v40 = vpop.f32.mrf.mxu0 }
 0x11f   :  { %v434_v41 = vsub.f32 %v2833_v58, %v291_v40 }
 0x121   :  { %330 = vmatmul.bf16.gmra.mxu0 %v166_v37  ;;  %562 = vmin.index.xlane.f32.xlu1 %v459_v42 }
 0x122   :  { %512 = vmin.index.xlane.f32.xlu0 %v434_v41  ;;  %410 = vmatmul.bf16.gmra.mxu2 %v182_v54 }
 0x124   :  { %v485_v45 = vpop.xlane.xlu0 %484  ;;  %v371_v63 = vpop.f32.mrf.mxu2 }
 0x125   :  { %vm614_vm0 = vcmp.eq.s32.totalorder %v2887_v43, %v485_v45  ;;  %v466_v32 = vsub.f32 %v2833_v58, %v371_v63 }
 0x126   :  { %v293_v47 = vpop.f32.mrf.mxu0  ;;  %2280 = vmatmul.msk.f32.vlgmr.msra.gmra.mxu1 %vm614_vm0, %v2767_v48  ;;  %v2216_v55 = vsel %vm614_vm0, 1.0, %v2766_v13 }
 0x127   :  { %v435_v49 = vsub.f32 %v2833_v58, %v293_v47 }
 0x129   :  { %514 = vmin.index.xlane.f32.xlu2 %v435_v49 }
 0x12a   :  { %564 = vmin.index.xlane.f32.xlu0 %v460_v46 }
 0x12c   :  { %v487_v53 = vpop.xlane.xlu0 %486  ;;  %v373_v6 = vpop.f32.mrf.mxu2 }
 0x12d   :  { %vm615_vm1 = vcmp.eq.s32.totalorder %v2887_v43, %v487_v53  ;;  %v467_v42 = vsub.f32 %v2833_v58, %v373_v6 }
 0x12e   :  { %v2217_v56 = vsel %vm615_vm1, 1.0, %v2766_v13  ;;  %v296_v57 = vpop.f32.mrf.mxu0  ;;  %2281 = vmatmul.msk.f32.gmra.mxu1 %vm615_vm1, %v2767_v48 }
 0x12f   :  { %v2353_v60 = vpack.c.bf16 %v2217_v56, %v2216_v55  ;;  %v1431_v61 = vadd.f32 %v2217_v56, %v2216_v55  ;;  %v436_v62 = vsub.f32 %v2833_v58, %v296_v57 }
 0x131   :  { %2354 = vst [vmem:[#allocation11] sm:$0xff] %v2353_v60   ;;  %566 = vmin.index.xlane.f32.xlu2 %v461_v59  ;;  %516 = vmin.index.xlane.f32.xlu1 %v436_v62 }
 0x134   :  { %v489_v0 = vpop.xlane.xlu1 %488 }
 0x135   :  { %vm616_vm2 = vcmp.eq.s32.totalorder %v2887_v43, %v489_v0  ;;  %v2914_v15 = vpop.f32.mrf.mxu2 }
 0x136   :  { %v2218_v2 = vsel %vm616_vm2, 1.0, %v2766_v13  ;;  %v298_v3 = vpop.f32.mrf.mxu0  ;;  %2282 = vmatmul.msk.f32.gmra.mxu1 %vm616_vm2, %v2767_v48  ;;  %v468_v50 = vsub.f32 %v2833_v58, %v2914_v15 }
 0x137   :  { %v1432_v4 = vadd.f32 %v2218_v2, %v1431_v61  ;;  %v437_v5 = vsub.f32 %v2833_v58, %v298_v3 }
 0x139   :  { %568 = vmin.index.xlane.f32.xlu1 %v462_v1  ;;  %518 = vmin.index.xlane.f32.xlu0 %v437_v5 }
 0x13c   :  { %v491_v7 = vpop.xlane.xlu1 %490 }
 0x13d   :  { %vm617_vm3 = vcmp.eq.s32.totalorder %v2887_v43, %v491_v7  ;;  %v2921_v22 = vpop.f32.mrf.mxu2 }
 0x13e   :  { %v2219_v8 = vsel %vm617_vm3, 1.0, %v2766_v13  ;;  %v301_v9 = vpop.f32.mrf.mxu0  ;;  %2283 = vmatmul.msk.f32.gmra.mxu1 %vm617_vm3, %v2767_v48  ;;  %v469_v63 = vsub.f32 %v2833_v58, %v2921_v22 }
 0x13f   :  { %v2356_v11 = vpack.c.bf16 %v2219_v8, %v2218_v2  ;;  %v1433_v12 = vadd.f32 %v2219_v8, %v1432_v4  ;;  %v438_v14 = vsub.f32 %v2833_v58, %v301_v9 }
 0x141   :  { %2448 = vst [vmem:[#allocation11 + $0x8] sm:$0xff] %v2356_v11   ;;  %570 = vmin.index.xlane.f32.xlu0 %v463_v10  ;;  %520 = vmin.index.xlane.f32.xlu2 %v438_v14 }
 0x144   :  { %v493_v16 = vpop.xlane.xlu2 %492 }
 0x145   :  { %vm618_vm4 = vcmp.eq.s32.totalorder %v2887_v43, %v493_v16  ;;  %v2929_v30 = vpop.f32.mrf.mxu2 }
 0x146   :  { %v2220_v18 = vsel %vm618_vm4, 1.0, %v2766_v13  ;;  %v303_v19 = vpop.f32.mrf.mxu0  ;;  %2284 = vmatmul.msk.f32.gmra.mxu1 %vm618_vm4, %v2767_v48  ;;  %v470_v7 = vsub.f32 %v2833_v58, %v2929_v30 }
 0x147   :  { %v1434_v20 = vadd.f32 %v2220_v18, %v1433_v12  ;;  %v439_v21 = vsub.f32 %v2833_v58, %v303_v19 }
 0x149   :  { %572 = vmin.index.xlane.f32.xlu2 %v464_v17  ;;  %522 = vmin.index.xlane.f32.xlu1 %v439_v21 }
 0x14c   :  { %v495_v23 = vpop.xlane.xlu2 %494 }
 0x14d   :  { %vm619_vm5 = vcmp.eq.s32.totalorder %v2887_v43, %v495_v23  ;;  %v2940_v37 = vpop.f32.mrf.mxu2 }
 0x14e   :  { %v2221_v24 = vsel %vm619_vm5, 1.0, %v2766_v13  ;;  %v306_v25 = vpop.f32.mrf.mxu0  ;;  %2285 = vmatmul.msk.f32.gmra.mxu1 %vm619_vm5, %v2767_v48 }
 0x14f   :  { %v2359_v27 = vpack.c.bf16 %v2221_v24, %v2220_v18  ;;  %v1435_v28 = vadd.f32 %v2221_v24, %v1434_v20  ;;  %v440_v29 = vsub.f32 %v2833_v58, %v306_v25  ;;  %v471_v20 = vsub.f32 %v2833_v58, %v2940_v37 }
 0x151   :  { %2449 = vst [vmem:[#allocation11 + $0x10] sm:$0xff] %v2359_v27   ;;  %574 = vmin.index.xlane.f32.xlu1 %v465_v26  ;;  %524 = vmin.index.xlane.f32.xlu0 %v440_v29 }
 0x154   :  { %v497_v31 = vpop.xlane.xlu0 %496 }
 0x155   :  { %vm620_vm6 = vcmp.eq.s32.totalorder %v2887_v43, %v497_v31  ;;  %v549_v33 = vpop.xlane.xlu2 %548  ;;  %v2947_v47 = vpop.f32.mrf.mxu2 }
 0x156   :  { %v2222_v34 = vsel %vm620_vm6, 1.0, %v2766_v13  ;;  %v308_v35 = vpop.f32.mrf.mxu0  ;;  %2286 = vmatmul.msk.f32.gmra.mxu1 %vm620_vm6, %v2767_v48  ;;  %vm646_vm7 = vcmp.eq.s32.totalorder %v2887_v43, %v549_v33 }
 0x157   :  { %v1436_v36 = vadd.f32 %v2222_v34, %v1435_v28  ;;  %v441_v38 = vsub.f32 %v2833_v58, %v308_v35  ;;  %2312 = vmatmul.msk.f32.vlgmr.msra.gmra.mxu3 %vm646_vm7, %v2767_v48  ;;  %v2955_v52 = vsel %vm646_vm7, 1.0, %v2766_v13  ;;  %v472_v28 = vsub.f32 %v2833_v58, %v2947_v47 }
 0x159   :  { %576 = vmin.index.xlane.f32.xlu0 %v466_v32  ;;  %526 = vmin.index.xlane.f32.xlu2 %v441_v38 }
 0x15c   :  { %v499_v39 = vpop.xlane.xlu1 %498 }
 0x15d   :  { %vm621_vm8 = vcmp.eq.s32.totalorder %v2887_v43, %v499_v39  ;;  %v2967_v60 = vpop.f32.mrf.mxu2 }
 0x15e   :  { %v2223_v40 = vsel %vm621_vm8, 1.0, %v2766_v13  ;;  %v311_v41 = vpop.f32.mrf.mxu0  ;;  %2287 = vmatmul.msk.f32.gmra.mxu1 %vm621_vm8, %v2767_v48 }
 0x15f   :  { %v2362_v44 = vpack.c.bf16 %v2223_v40, %v2222_v34  ;;  %v1437_v45 = vadd.f32 %v2223_v40, %v1436_v36  ;;  %v442_v46 = vsub.f32 %v2833_v58, %v311_v41  ;;  %v473_v40 = vsub.f32 %v2833_v58, %v2967_v60 }
 0x161   :  { %2450 = vst [vmem:[#allocation11 + $0x18] sm:$0xff] %v2362_v44   ;;  %578 = vmin.index.xlane.f32.xlu2 %v467_v42  ;;  %528 = vmin.index.xlane.f32.xlu1 %v442_v46 }
 0x164   :  { %v551_v49 = vpop.xlane.xlu1 %550 }
 0x165   :  { %vm647_vm9 = vcmp.eq.s32.totalorder %v2887_v43, %v551_v49  ;;  %v501_v51 = vpop.xlane.xlu0 %500  ;;  %v2979_v5 = vpop.f32.mrf.mxu2 }
 0x166   :  { %v2958_v53 = vsel %vm647_vm9, 1.0, %v2766_v13  ;;  %vm622_vm10 = vcmp.eq.s32.totalorder %v2887_v43, %v501_v51  ;;  %v313_v54 = vpop.f32.mrf.mxu0  ;;  %2313 = vmatmul.msk.f32.gmra.mxu3 %vm647_vm9, %v2767_v48 }
 0x167   :  { %v2401_v55 = vpack.c.bf16 %v2958_v53, %v2955_v52  ;;  %v2224_v56 = vsel %vm622_vm10, 1.0, %v2766_v13  ;;  %v443_v57 = vsub.f32 %v2833_v58, %v313_v54  ;;  %2288 = vmatmul.msk.f32.gmra.mxu1 %vm622_vm10, %v2767_v48 }
 0x168   :  { %v1438_v59 = vadd.f32 %v2224_v56, %v1437_v45 }
 0x169   :  { %2463 = vst [vmem:[#allocation11 + $0x80] sm:$0xff] %v2401_v55   ;;  %580 = vmin.index.xlane.f32.xlu1 %v468_v50  ;;  %530 = vmin.index.xlane.f32.xlu0 %v443_v57  ;;  %v474_v50 = vsub.f32 %v2833_v58, %v2979_v5 }
 0x16c   :  { %v503_v61 = vpop.xlane.xlu2 %502 }
 0x16d   :  { %v553_v62 = vpop.xlane.xlu0 %552  ;;  %vm623_vm11 = vcmp.eq.s32.totalorder %v2887_v43, %v503_v61  ;;  %v2999_v17 = vpop.f32.mrf.mxu2 }
 0x16e   :  { %vm648_vm12 = vcmp.eq.s32.totalorder %v2887_v43, %v553_v62  ;;  %v2225_v0 = vsel %vm623_vm11, 1.0, %v2766_v13  ;;  %v316_v1 = vpop.f32.mrf.mxu0 }
 0x16f   :  { %v2365_v2 = vpack.c.bf16 %v2225_v0, %v2224_v56  ;;  %v1439_v3 = vadd.f32 %v2225_v0, %v1438_v59  ;;  %v444_v4 = vsub.f32 %v2833_v58, %v316_v1  ;;  %2289 = vmatmul.msk.f32.gmra.mxu1 %vm623_vm11, %v2767_v48  ;;  %2314 = vmatmul.msk.f32.gmra.mxu3 %vm648_vm12, %v2767_v48  ;;  %v2987_v9 = vsel %vm648_vm12, 1.0, %v2766_v13 }
 0x170   :  { %v475_v1 = vsub.f32 %v2833_v58, %v2999_v17 }
 0x171   :  { %2451 = vst [vmem:[#allocation11 + $0x20] sm:$0xff] %v2365_v2   ;;  %582 = vmin.index.xlane.f32.xlu0 %v469_v63  ;;  %532 = vmin.index.xlane.f32.xlu2 %v444_v4 }
 0x174   :  { %v555_v6 = vpop.xlane.xlu2 %554 }
 0x175   :  { %vm649_vm13 = vcmp.eq.s32.totalorder %v2887_v43, %v555_v6  ;;  %v505_v8 = vpop.xlane.xlu1 %504  ;;  %v3011_v26 = vpop.f32.mrf.mxu2 }
 0x176   :  { %v2990_v10 = vsel %vm649_vm13, 1.0, %v2766_v13  ;;  %vm624_vm14 = vcmp.eq.s32.totalorder %v2887_v43, %v505_v8  ;;  %v318_v11 = vpop.f32.mrf.mxu0 }
 0x177   :  { %v2404_v12 = vpack.c.bf16 %v2990_v10, %v2987_v9  ;;  %v2226_v14 = vsel %vm624_vm14, 1.0, %v2766_v13  ;;  %v445_v15 = vsub.f32 %v2833_v58, %v318_v11  ;;  %2290 = vmatmul.msk.f32.gmra.mxu1 %vm624_vm14, %v2767_v48  ;;  %2315 = vmatmul.msk.f32.gmra.mxu3 %vm649_vm13, %v2767_v48 }
 0x178   :  { %v1440_v16 = vadd.f32 %v2226_v14, %v1439_v3 }
 0x179   :  { %2464 = vst [vmem:[#allocation11 + $0x88] sm:$0xff] %v2404_v12   ;;  %584 = vmin.index.xlane.f32.xlu2 %v470_v7  ;;  %534 = vmin.index.xlane.f32.xlu1 %v445_v15 }
 0x17c   :  { %v507_v18 = vpop.xlane.xlu0 %506 }
 0x17d   :  { %v557_v19 = vpop.xlane.xlu1 %556  ;;  %vm625_vm15 = vcmp.eq.s32.totalorder %v2887_v43, %v507_v18  ;;  %v3031_v38 = vpop.f32.mrf.mxu2 }
 0x17e   :  { %vm650_vm0 = vcmp.eq.s32.totalorder %v2887_v43, %v557_v19  ;;  %v2227_v21 = vsel %vm625_vm15, 1.0, %v2766_v13  ;;  %v321_v22 = vpop.f32.mrf.mxu0  ;;  %v477_v19 = vsub.f32 %v2833_v58, %v3031_v38 }
 0x17f   :  { %v2368_v23 = vpack.c.bf16 %v2227_v21, %v2226_v14  ;;  %v1441_v24 = vadd.f32 %v2227_v21, %v1440_v16  ;;  %v446_v25 = vsub.f32 %v2833_v58, %v321_v22  ;;  %2291 = vmatmul.msk.f32.gmra.mxu1 %vm625_vm15, %v2767_v48  ;;  %2316 = vmatmul.msk.f32.gmra.mxu3 %vm650_vm0, %v2767_v48  ;;  %v3019_v30 = vsel %vm650_vm0, 1.0, %v2766_v13 }
 0x180   :  { %v476_v14 = vsub.f32 %v2833_v58, %v3011_v26 }
 0x181   :  { %2452 = vst [vmem:[#allocation11 + $0x28] sm:$0xff] %v2368_v23   ;;  %586 = vmin.index.xlane.f32.xlu1 %v471_v20  ;;  %536 = vmin.index.xlane.f32.xlu0 %v446_v25 }
 0x184   :  { %v559_v27 = vpop.xlane.xlu0 %558 }
 0x185   :  { %vm651_vm1 = vcmp.eq.s32.totalorder %v2887_v43, %v559_v27  ;;  %v509_v29 = vpop.xlane.xlu2 %508  ;;  %v3043_v47 = vpop.f32.mrf.mxu2 }
 0x186   :  { %v3022_v31 = vsel %vm651_vm1, 1.0, %v2766_v13  ;;  %vm626_vm2 = vcmp.eq.s32.totalorder %v2887_v43, %v509_v29  ;;  %v323_v32 = vpop.f32.mrf.mxu0  ;;  %v478_v27 = vsub.f32 %v2833_v58, %v3043_v47 }
 0x187   :  { %v2407_v33 = vpack.c.bf16 %v3022_v31, %v3019_v30  ;;  %v2228_v34 = vsel %vm626_vm2, 1.0, %v2766_v13  ;;  %v447_v35 = vsub.f32 %v2833_v58, %v323_v32  ;;  %2292 = vmatmul.msk.f32.gmra.mxu1 %vm626_vm2, %v2767_v48  ;;  %2317 = vmatmul.msk.f32.gmra.mxu3 %vm651_vm1, %v2767_v48 }
 0x188   :  { %v1442_v36 = vadd.f32 %v2228_v34, %v1441_v24 }
 0x189   :  { %2465 = vst [vmem:[#allocation11 + $0x90] sm:$0xff] %v2407_v33   ;;  %588 = vmin.index.xlane.f32.xlu0 %v472_v28  ;;  %538 = vmin.index.xlane.f32.xlu2 %v447_v35 }
 0x18c   :  { %v511_v37 = vpop.xlane.xlu1 %510 }
 0x18d   :  { %v561_v39 = vpop.xlane.xlu2 %560  ;;  %vm627_vm3 = vcmp.eq.s32.totalorder %v2887_v43, %v511_v37  ;;  %v403_v62 = vpop.f32.mrf.mxu2 }
 0x18e   :  { %vm652_vm4 = vcmp.eq.s32.totalorder %v2887_v43, %v561_v39  ;;  %v2229_v41 = vsel %vm627_vm3, 1.0, %v2766_v13  ;;  %v326_v42 = vpop.f32.mrf.mxu0  ;;  %v479_v28 = vsub.f32 %v2833_v58, %v403_v62 }
 0x18f   :  { %v2371_v44 = vpack.c.bf16 %v2229_v41, %v2228_v34  ;;  %v1443_v45 = vadd.f32 %v2229_v41, %v1442_v36  ;;  %v448_v46 = vsub.f32 %v2833_v58, %v326_v42  ;;  %2293 = vmatmul.msk.f32.gmra.mxu1 %vm627_vm3, %v2767_v48  ;;  %2318 = vmatmul.msk.f32.gmra.mxu3 %vm652_vm4, %v2767_v48  ;;  %v3051_v54 = vsel %vm652_vm4, 1.0, %v2766_v13 }
 0x191   :  { %2453 = vst [vmem:[#allocation11 + $0x30] sm:$0xff] %v2371_v44   ;;  %590 = vmin.index.xlane.f32.xlu2 %v473_v40  ;;  %540 = vmin.index.xlane.f32.xlu1 %v448_v46 }
 0x194   :  { %v563_v49 = vpop.xlane.xlu1 %562 }
 0x195   :  { %vm653_vm5 = vcmp.eq.s32.totalorder %v2887_v43, %v563_v49  ;;  %v513_v51 = vpop.xlane.xlu0 %512  ;;  %v406_v7 = vpop.f32.mrf.mxu2 }
 0x196   :  { %v3054_v55 = vsel %vm653_vm5, 1.0, %v2766_v13  ;;  %vm628_vm6 = vcmp.eq.s32.totalorder %v2887_v43, %v513_v51  ;;  %v328_v56 = vpop.f32.mrf.mxu0  ;;  %v480_v32 = vsub.f32 %v2833_v58, %v406_v7 }
 0x197   :  { %v2410_v57 = vpack.c.bf16 %v3054_v55, %v3051_v54  ;;  %v2230_v59 = vsel %vm628_vm6, 1.0, %v2766_v13  ;;  %v449_v60 = vsub.f32 %v2833_v58, %v328_v56  ;;  %2294 = vmatmul.msk.f32.gmra.mxu1 %vm628_vm6, %v2767_v48  ;;  %2319 = vmatmul.msk.f32.gmra.mxu3 %vm653_vm5, %v2767_v48 }
 0x198   :  { %v1444_v61 = vadd.f32 %v2230_v59, %v1443_v45 }
 0x199   :  { %2466 = vst [vmem:[#allocation11 + $0x98] sm:$0xff] %v2410_v57   ;;  %592 = vmin.index.xlane.f32.xlu1 %v474_v50  ;;  %542 = vmin.index.xlane.f32.xlu0 %v449_v60 }
 0x19c   :  { %v515_v63 = vpop.xlane.xlu2 %514 }
 0x19d   :  { %v565_v0 = vpop.xlane.xlu0 %564  ;;  %vm629_vm7 = vcmp.eq.s32.totalorder %v2887_v43, %v515_v63  ;;  %v408_v23 = vpop.f32.mrf.mxu2 }
 0x19e   :  { %vm654_vm8 = vcmp.eq.s32.totalorder %v2887_v43, %v565_v0  ;;  %v2231_v2 = vsel %vm629_vm7, 1.0, %v2766_v13  ;;  %v331_v3 = vpop.f32.mrf.mxu0  ;;  %v481_v39 = vsub.f32 %v2833_v58, %v408_v23 }
 0x19f   :  { %v2374_v4 = vpack.c.bf16 %v2231_v2, %v2230_v59  ;;  %v1445_v5 = vadd.f32 %v2231_v2, %v1444_v61  ;;  %v450_v6 = vsub.f32 %v2833_v58, %v331_v3  ;;  %2295 = vmatmul.msk.f32.gmra.mxu1 %vm629_vm7, %v2767_v48  ;;  %2320 = vmatmul.msk.f32.gmra.mxu3 %vm654_vm8, %v2767_v48  ;;  %v3083_v15 = vsel %vm654_vm8, 1.0, %v2766_v13 }
 0x1a1   :  { %2454 = vst [vmem:[#allocation11 + $0x38] sm:$0xff] %v2374_v4   ;;  %594 = vmin.index.xlane.f32.xlu0 %v475_v1  ;;  %544 = vmin.index.xlane.f32.xlu2 %v450_v6 }
 0x1a3   :  { %v3073_v8 = vpop.f32.mrf.mxu1 }
 0x1a4   :  { %1159 = vst [vmem:[#allocation10] sm:$0xff] %v3073_v8  ;;  %v567_v11 = vpop.xlane.xlu2 %566  ;;  %v517_v12 = vpop.xlane.xlu1 %516 }
 0x1a5   :  { %vm655_vm9 = vcmp.eq.s32.totalorder %v2887_v43, %v567_v11  ;;  %vm630_vm10 = vcmp.eq.s32.totalorder %v2887_v43, %v517_v12  ;;  %v411_v35 = vpop.f32.mrf.mxu2 }
 0x1a6   :  { %v3086_v16 = vsel %vm655_vm9, 1.0, %v2766_v13  ;;  %v2232_v17 = vsel %vm630_vm10, 1.0, %v2766_v13  ;;  %v333_v18 = vpop.f32.mrf.mxu0  ;;  %v482_v40 = vsub.f32 %v2833_v58, %v411_v35 }
 0x1a7   :  { %v2413_v20 = vpack.c.bf16 %v3086_v16, %v3083_v15  ;;  %v1446_v21 = vadd.f32 %v2232_v17, %v1445_v5  ;;  %v451_v22 = vsub.f32 %v2833_v58, %v333_v18  ;;  %2296 = vmatmul.msk.f32.gmra.mxu1 %vm630_vm10, %v2767_v48  ;;  %2321 = vmatmul.msk.f32.gmra.mxu3 %vm655_vm9, %v2767_v48 }
 0x1a9   :  { %2467 = vst [vmem:[#allocation11 + $0xa0] sm:$0xff] %v2413_v20   ;;  %596 = vmin.index.xlane.f32.xlu2 %v476_v14  ;;  %546 = vmin.index.xlane.f32.xlu1 %v451_v22  ;;  %v2517_v20 = vld [vmem:[#allocation4 + $0x8] sm:$0xff]  ;;  %v2518_v22 = vld [vmem:[#allocation4] sm:$0xff] }
 0x1aa   :  { %598 = vmin.index.xlane.f32.xlu0 %v477_v19  ;;  %v1223_v23 = vsub.f32 %v3073_v8, %v2518_v22 }
 0x1ab   :  { %v3096_v24 = vpop.f32.mrf.mxu1 }
 0x1ac   :  { %1160 = vst [vmem:[#allocation10 + $0x8] sm:$0xff] %v3096_v24  ;;  %v569_v25 = vpop.xlane.xlu1 %568  ;;  %v519_v26 = vpop.xlane.xlu0 %518 }
 0x1ad   :  { %vm656_vm11 = vcmp.eq.s32.totalorder %v2887_v43, %v569_v25  ;;  %vm631_vm12 = vcmp.eq.s32.totalorder %v2887_v43, %v519_v26  ;;  %v413_v47 = vpop.f32.mrf.mxu2  ;;  %v2519_v25 = vld [vmem:[#allocation4 + $0x10] sm:$0xff] }
 0x1ae   :  { %v2233_v29 = vsel %vm631_vm12, 1.0, %v2766_v13  ;;  %v3120_v41 = vsel %vm656_vm11, 1.0, %v2766_v13  ;;  %v483_v49 = vsub.f32 %v2833_v58, %v413_v47 }
 0x1af   :  { %v2377_v33 = vpack.c.bf16 %v2233_v29, %v2232_v17  ;;  %v1447_v34 = vadd.f32 %v2233_v29, %v1446_v21  ;;  %2297 = vmatmul.msk.f32.gmra.mxu1 %vm631_vm12, %v2767_v48  ;;  %2322 = vmatmul.msk.f32.gmra.mxu3 %vm656_vm11, %v2767_v48  ;;  %v1224_v21 = vsub.f32 %v3096_v24, %v2517_v20  ;;  %v2521_v24 = vld [vmem:[#allocation4 + $0x20] sm:$0xff] }
 0x1b1   :  { %2455 = vst [vmem:[#allocation11 + $0x40] sm:$0xff] %v2377_v33   ;;  %600 = vmin.index.xlane.f32.xlu1 %v478_v27  ;;  %602 = vmin.index.xlane.f32.xlu2 %v479_v28  ;;  %v1288_v29 = vmul.f32 %v1224_v21, %v1224_v21 }
 0x1b2   :  { %604 = vmin.index.xlane.f32.xlu0 %v480_v32  ;;  %v2520_v32 = vld [vmem:[#allocation4 + $0x18] sm:$0xff] }
 0x1b3   :  { %v3110_v36 = vpop.f32.mrf.mxu1 }
 0x1b4   :  { %1161 = vst [vmem:[#allocation10 + $0x10] sm:$0xff] %v3110_v36  ;;  %v571_v38 = vpop.xlane.xlu0 %570  ;;  %v521_v37 = vpop.xlane.xlu2 %520  ;;  %v1225_v26 = vsub.f32 %v3110_v36, %v2519_v25 }
 0x1b5   :  { %vm657_vm13 = vcmp.eq.s32.totalorder %v2887_v43, %v571_v38  ;;  %vm632_vm14 = vcmp.eq.s32.totalorder %v2887_v43, %v521_v37  ;;  %v1287_v38 = vmul.f32 %v1223_v23, %v1223_v23 }
 0x1b6   :  { %v3123_v42 = vsel %vm657_vm13, 1.0, %v2766_v13  ;;  %v2234_v44 = vsel %vm632_vm14, 1.0, %v2766_v13  ;;  %v1289_v8 = vmul.f32 %v1225_v26, %v1225_v26 }
 0x1b7   :  { %v2416_v45 = vpack.c.bf16 %v3123_v42, %v3120_v41  ;;  %v1448_v46 = vadd.f32 %v2234_v44, %v1447_v34  ;;  %2298 = vmatmul.msk.f32.gmra.mxu1 %vm632_vm14, %v2767_v48  ;;  %2323 = vmatmul.msk.f32.gmra.mxu3 %vm657_vm13, %v2767_v48 }
 0x1b9   :  { %2468 = vst [vmem:[#allocation11 + $0xa8] sm:$0xff] %v2416_v45   ;;  %606 = vmin.index.xlane.f32.xlu1 %v481_v39  ;;  %608 = vmin.index.xlane.f32.xlu2 %v482_v40 }
 0x1ba   :  { %610 = vmin.index.xlane.f32.xlu0 %v483_v49 }
 0x1bb   :  { %v976_v50 = vpop.f32.mrf.mxu1 }
 0x1bc   :  { %1162 = vst [vmem:[#allocation10 + $0x18] sm:$0xff] %v976_v50  ;;  %v573_v51 = vpop.xlane.xlu2 %572  ;;  %v523_v56 = vpop.xlane.xlu1 %522  ;;  %v1226_v33 = vsub.f32 %v976_v50, %v2520_v32  ;;  %v2526_v32 = vld [vmem:[#allocation4 + $0x48] sm:$0xff] }
 0x1bd   :  { %vm658_vm15 = vcmp.eq.s32.totalorder %v2887_v43, %v573_v51  ;;  %vm633_vm0 = vcmp.eq.s32.totalorder %v2887_v43, %v523_v56  ;;  %v2523_v51 = vld [vmem:[#allocation4 + $0x30] sm:$0xff] }
 0x1be   :  { %v2235_v57 = vsel %vm633_vm0, 1.0, %v2766_v13  ;;  %v3141_v63 = vsel %vm658_vm15, 1.0, %v2766_v13  ;;  %v1290_v45 = vmul.f32 %v1226_v33, %v1226_v33 }
 0x1bf   :  { %v2380_v59 = vpack.c.bf16 %v2235_v57, %v2234_v44  ;;  %v3134_v60 = vadd.f32 %v2235_v57, %v1448_v46  ;;  %2299 = vmatmul.msk.f32.gmra.mxu1 %vm633_vm0, %v2767_v48  ;;  %2324 = vmatmul.msk.f32.gmra.mxu3 %vm658_vm15, %v2767_v48  ;;  %v1359_v44 = vadd.f32 %v1288_v29, %v1287_v38  ;;  %v2522_v46 = vld [vmem:[#allocation4 + $0x28] sm:$0xff] }
 0x1c1   :  { %2456 = vst [vmem:[#allocation11 + $0x48] sm:$0xff] %v2380_v59   ;;  %v1360_v49 = vadd.f32 %v1359_v44, %v1289_v8 }
 0x1c3   :  { %v979_v58 = vpop.f32.mrf.mxu1  ;;  %v1361_v57 = vadd.f32 %v1360_v49, %v1290_v45 }
 0x1c4   :  { %1163 = vst [vmem:[#allocation10 + $0x20] sm:$0xff] %v979_v58  ;;  %v575_v61 = vpop.xlane.xlu1 %574  ;;  %v525_v62 = vpop.xlane.xlu0 %524  ;;  %v1227_v37 = vsub.f32 %v979_v58, %v2521_v24 }
 0x1c5   :  { %vm659_vm1 = vcmp.eq.s32.totalorder %v2887_v43, %v575_v61  ;;  %vm634_vm2 = vcmp.eq.s32.totalorder %v2887_v43, %v525_v62  ;;  %v2524_v62 = vld [vmem:[#allocation4 + $0x38] sm:$0xff] }
 0x1c6   :  { %v3144_v0 = vsel %vm659_vm1, 1.0, %v2766_v13  ;;  %v3153_v5 = vsel %vm634_vm2, 1.0, %v2766_v13  ;;  %v1291_v50 = vmul.f32 %v1227_v37, %v1227_v37 }
 0x1c7   :  { %v2419_v1 = vpack.c.bf16 %v3144_v0, %v3141_v63  ;;  %2300 = vmatmul.msk.f32.gmra.mxu1 %vm634_vm2, %v2767_v48  ;;  %2325 = vmatmul.msk.f32.gmra.mxu3 %vm659_vm1, %v2767_v48 }
 0x1c9   :  { %2469 = vst [vmem:[#allocation11 + $0xb0] sm:$0xff] %v2419_v1  }
 0x1cb   :  { %v982_v2 = vpop.f32.mrf.mxu1 }
 0x1cc   :  { %1164 = vst [vmem:[#allocation10 + $0x28] sm:$0xff] %v982_v2  ;;  %v577_v3 = vpop.xlane.xlu0 %576  ;;  %v527_v4 = vpop.xlane.xlu2 %526  ;;  %v1228_v47 = vsub.f32 %v982_v2, %v2522_v46 }
 0x1cd   :  { %vm660_vm3 = vcmp.eq.s32.totalorder %v2887_v43, %v577_v3  ;;  %vm635_vm4 = vcmp.eq.s32.totalorder %v2887_v43, %v527_v4  ;;  %v1362_v4 = vadd.f32 %v1361_v57, %v1291_v50 }
 0x1ce   :  { %v3156_v6 = vsel %vm635_vm4, 1.0, %v2766_v13  ;;  %v3165_v17 = vsel %vm660_vm3, 1.0, %v2766_v13  ;;  %v1292_v61 = vmul.f32 %v1228_v47, %v1228_v47  ;;  %v2527_v47 = vld [vmem:[#allocation4 + $0x50] sm:$0xff] }
 0x1cf   :  { %v2383_v7 = vpack.c.bf16 %v3156_v6, %v3153_v5  ;;  %2301 = vmatmul.msk.f32.gmra.mxu1 %vm635_vm4, %v2767_v48  ;;  %2326 = vmatmul.msk.f32.gmra.mxu3 %vm660_vm3, %v2767_v48 }
 0x1d0   :  { %v1363_v20 = vadd.f32 %v1362_v4, %v1292_v61 }
 0x1d1   :  { %2457 = vst [vmem:[#allocation11 + $0x50] sm:$0xff] %v2383_v7  }
 0x1d3   :  { %v985_v11 = vpop.f32.mrf.mxu1 }
 0x1d4   :  { %1165 = vst [vmem:[#allocation10 + $0x30] sm:$0xff] %v985_v11  ;;  %v579_v12 = vpop.xlane.xlu2 %578  ;;  %v529_v14 = vpop.xlane.xlu1 %528  ;;  %v1229_v56 = vsub.f32 %v985_v11, %v2523_v51 }
 0x1d5   :  { %vm661_vm5 = vcmp.eq.s32.totalorder %v2887_v43, %v579_v12  ;;  %vm636_vm6 = vcmp.eq.s32.totalorder %v2887_v43, %v529_v14  ;;  %v2525_v12 = vld [vmem:[#allocation4 + $0x40] sm:$0xff] }
 0x1d6   :  { %v3168_v18 = vsel %vm661_vm5, 1.0, %v2766_v13  ;;  %v3187_v36 = vsel %vm636_vm6, 1.0, %v2766_v13  ;;  %v1293_v11 = vmul.f32 %v1229_v56, %v1229_v56 }
 0x1d7   :  { %v2422_v19 = vpack.c.bf16 %v3168_v18, %v3165_v17  ;;  %2302 = vmatmul.msk.f32.gmra.mxu1 %vm636_vm6, %v2767_v48  ;;  %2327 = vmatmul.msk.f32.gmra.mxu3 %vm661_vm5, %v2767_v48 }
 0x1d8   :  { %v1364_v23 = vadd.f32 %v1363_v20, %v1293_v11 }
 0x1d9   :  { %2470 = vst [vmem:[#allocation11 + $0xb8] sm:$0xff] %v2422_v19  }
 0x1da   :  { %v3179_v27 = vpop.f32.mrf.mxu3 }
 0x1db   :  { %v988_v28 = vpop.f32.mrf.mxu1  ;;  %1191 = vst [vmem:[#allocation10 + $0x100] sm:$0xff] %v3179_v27 }
 0x1dc   :  { %1166 = vst [vmem:[#allocation10 + $0x38] sm:$0xff] %v988_v28  ;;  %v581_v34 = vpop.xlane.xlu1 %580  ;;  %v531_v35 = vpop.xlane.xlu0 %530  ;;  %v1230_v1 = vsub.f32 %v988_v28, %v2524_v62 }
 0x1dd   :  { %vm662_vm7 = vcmp.eq.s32.totalorder %v2887_v43, %v581_v34  ;;  %vm637_vm8 = vcmp.eq.s32.totalorder %v2887_v43, %v531_v35 }
 0x1de   :  { %v3190_v39 = vsel %vm637_vm8, 1.0, %v2766_v13  ;;  %v3202_v2 = vsel %vm662_vm7, 1.0, %v2766_v13  ;;  %v1294_v21 = vmul.f32 %v1230_v1, %v1230_v1 }
 0x1df   :  { %v2386_v40 = vpack.c.bf16 %v3190_v39, %v3187_v36  ;;  %2303 = vmatmul.msk.f32.gmra.mxu1 %vm637_vm8, %v2767_v48  ;;  %2328 = vmatmul.msk.f32.gmra.mxu3 %vm662_vm7, %v2767_v48 }
 0x1e0   :  { %v1365_v29 = vadd.f32 %v1364_v23, %v1294_v21 }
 0x1e1   :  { %2458 = vst [vmem:[#allocation11 + $0x58] sm:$0xff] %v2386_v40  }
 0x1e4   :  { %v991_v59 = vpop.f32.mrf.mxu1  ;;  %v583_v58 = vpop.xlane.xlu0 %582 }
 0x1e5   :  { %1167 = vst [vmem:[#allocation10 + $0x40] sm:$0xff] %v991_v59  ;;  %vm663_vm9 = vcmp.eq.s32.totalorder %v2887_v43, %v583_v58  ;;  %v533_v3 = vpop.xlane.xlu2 %532  ;;  %v1231_v14 = vsub.f32 %v991_v59, %v2525_v12 }
 0x1e6   :  { %v3205_v7 = vsel %vm663_vm9, 1.0, %v2766_v13  ;;  %vm638_vm10 = vcmp.eq.s32.totalorder %v2887_v43, %v533_v3  ;;  %v2528_v3 = vld [vmem:[#allocation4 + $0x58] sm:$0xff] }
 0x1e7   :  { %v2425_v19 = vpack.c.bf16 %v3205_v7, %v3202_v2  ;;  %2304 = vmatmul.msk.f32.gmra.mxu1 %vm638_vm10, %v2767_v48  ;;  %2329 = vmatmul.msk.f32.gmra.mxu3 %vm663_vm9, %v2767_v48  ;;  %v1295_v25 = vmul.f32 %v1231_v14, %v1231_v14  ;;  %v3221_v35 = vsel %vm638_vm10, 1.0, %v2766_v13 }
 0x1e9   :  { %2471 = vst [vmem:[#allocation11 + $0xc0] sm:$0xff] %v2425_v19   ;;  %v3214_v22 = vpop.f32.mrf.mxu3  ;;  %v1366_v8 = vadd.f32 %v1365_v29, %v1295_v25 }
 0x1ea   :  { %1192 = vst [vmem:[#allocation10 + $0x108] sm:$0xff] %v3214_v22 }
 0x1ec   :  { %v994_v26 = vpop.f32.mrf.mxu1  ;;  %v535_v28 = vpop.xlane.xlu1 %534 }
 0x1ed   :  { %1168 = vst [vmem:[#allocation10 + $0x48] sm:$0xff] %v994_v26  ;;  %v1232_v33 = vsub.f32 %v994_v26, %v2526_v32  ;;  %v585_v34 = vpop.xlane.xlu2 %584  ;;  %vm639_vm11 = vcmp.eq.s32.totalorder %v2887_v43, %v535_v28  ;;  %v2529_v28 = vld [vmem:[#allocation4 + $0x60] sm:$0xff] }
 0x1ee   :  { %vm664_vm12 = vcmp.eq.s32.totalorder %v2887_v43, %v585_v34  ;;  %v3225_v38 = vsel %vm639_vm11, 1.0, %v2766_v13 }
 0x1ef   :  { %v1296_v24 = vmul.f32 %v1232_v33, %v1232_v33  ;;  %v2389_v37 = vpack.c.bf16 %v3225_v38, %v3221_v35  ;;  %2305 = vmatmul.msk.f32.gmra.mxu1 %vm639_vm11, %v2767_v48  ;;  %2330 = vmatmul.msk.f32.gmra.mxu3 %vm664_vm12, %v2767_v48  ;;  %v3240_v51 = vsel %vm664_vm12, 1.0, %v2766_v13 }
 0x1f1   :  { %v1367_v40 = vadd.f32 %v1366_v8, %v1296_v24  ;;  %2459 = vst [vmem:[#allocation11 + $0x60] sm:$0xff] %v2389_v37   ;;  %v1450_v37 = vadd.f32 %v3153_v5, %v3134_v60 }
 0x1f2   :  { %v3233_v44 = vpop.f32.mrf.mxu3 }
 0x1f3   :  { %1193 = vst [vmem:[#allocation10 + $0x110] sm:$0xff] %v3233_v44 }
 0x1f4   :  { %v997_v45 = vpop.f32.mrf.mxu1  ;;  %v587_v46 = vpop.xlane.xlu1 %586 }
 0x1f5   :  { %1169 = vst [vmem:[#allocation10 + $0x50] sm:$0xff] %v997_v45  ;;  %v1233_v49 = vsub.f32 %v997_v45, %v2527_v47  ;;  %vm665_vm13 = vcmp.eq.s32.totalorder %v2887_v43, %v587_v46  ;;  %v537_v50 = vpop.xlane.xlu0 %536  ;;  %v1451_v46 = vadd.f32 %v3156_v6, %v1450_v37 }
 0x1f6   :  { %v3243_v56 = vsel %vm665_vm13, 1.0, %v2766_v13  ;;  %vm640_vm14 = vcmp.eq.s32.totalorder %v2887_v43, %v537_v50 }
 0x1f7   :  { %v1297_v57 = vmul.f32 %v1233_v49, %v1233_v49  ;;  %v2428_v59 = vpack.c.bf16 %v3243_v56, %v3240_v51  ;;  %2306 = vmatmul.msk.f32.gmra.mxu1 %vm640_vm14, %v2767_v48  ;;  %2331 = vmatmul.msk.f32.gmra.mxu3 %vm665_vm13, %v2767_v48  ;;  %v2242_v12 = vsel %vm640_vm14, 1.0, %v2766_v13  ;;  %v1452_v50 = vadd.f32 %v3187_v36, %v1451_v46 }
 0x1f9   :  { %v1368_v58 = vadd.f32 %v1367_v40, %v1297_v57  ;;  %2472 = vst [vmem:[#allocation11 + $0xc8] sm:$0xff] %v2428_v59   ;;  %v2530_v57 = vld [vmem:[#allocation4 + $0x68] sm:$0xff]  ;;  %v1453_v6 = vadd.f32 %v3190_v39, %v1452_v50 }
 0x1fa   :  { %v3252_v61 = vpop.f32.mrf.mxu3 }
 0x1fb   :  { %1194 = vst [vmem:[#allocation10 + $0x118] sm:$0xff] %v3252_v61  ;;  %v1454_v36 = vadd.f32 %v3221_v35, %v1453_v6 }
 0x1fc   :  { %v1000_v62 = vpop.f32.mrf.mxu1  ;;  %v539_v1 = vpop.xlane.xlu2 %538 }
 0x1fd   :  { %1170 = vst [vmem:[#allocation10 + $0x58] sm:$0xff] %v1000_v62  ;;  %v1234_v4 = vsub.f32 %v1000_v62, %v2528_v3  ;;  %v589_v11 = vpop.xlane.xlu0 %588  ;;  %vm641_vm15 = vcmp.eq.s32.totalorder %v2887_v43, %v539_v1 }
 0x1fe   :  { %vm666_vm0 = vcmp.eq.s32.totalorder %v2887_v43, %v589_v11  ;;  %v2243_v14 = vsel %vm641_vm15, 1.0, %v2766_v13  ;;  %v1455_v11 = vadd.f32 %v3225_v38, %v1454_v36 }
 0x1ff   :  { %v1298_v19 = vmul.f32 %v1234_v4, %v1234_v4  ;;  %v2392_v20 = vpack.c.bf16 %v2243_v14, %v2242_v12  ;;  %2307 = vmatmul.msk.f32.gmra.mxu1 %vm641_vm15, %v2767_v48  ;;  %2332 = vmatmul.msk.f32.gmra.mxu3 %vm666_vm0, %v2767_v48  ;;  %v3272_v33 = vsel %vm666_vm0, 1.0, %v2766_v13 }
 0x201   :  { %v1369_v21 = vadd.f32 %v1368_v58, %v1298_v19  ;;  %2460 = vst [vmem:[#allocation11 + $0x68] sm:$0xff] %v2392_v20   ;;  %v1456_v20 = vadd.f32 %v2242_v12, %v1455_v11 }
 0x202   :  { %v3265_v23 = vpop.f32.mrf.mxu3 }
 0x203   :  { %1195 = vst [vmem:[#allocation10 + $0x120] sm:$0xff] %v3265_v23  ;;  %v1457_v38 = vadd.f32 %v2243_v14, %v1456_v20 }
 0x204   :  { %v1003_v25 = vpop.f32.mrf.mxu1  ;;  %v591_v26 = vpop.xlane.xlu2 %590 }
 0x205   :  { %1171 = vst [vmem:[#allocation10 + $0x60] sm:$0xff] %v1003_v25  ;;  %v1235_v29 = vsub.f32 %v1003_v25, %v2529_v28  ;;  %vm667_vm1 = vcmp.eq.s32.totalorder %v2887_v43, %v591_v26  ;;  %v541_v32 = vpop.xlane.xlu1 %540 }
 0x206   :  { %v3275_v34 = vsel %vm667_vm1, 1.0, %v2766_v13  ;;  %vm642_vm2 = vcmp.eq.s32.totalorder %v2887_v43, %v541_v32 }
 0x207   :  { %v1299_v8 = vmul.f32 %v1235_v29, %v1235_v29  ;;  %v2431_v24 = vpack.c.bf16 %v3275_v34, %v3272_v33  ;;  %2308 = vmatmul.msk.f32.gmra.mxu1 %vm642_vm2, %v2767_v48  ;;  %2333 = vmatmul.msk.f32.gmra.mxu3 %vm667_vm1, %v2767_v48  ;;  %v2244_v60 = vsel %vm642_vm2, 1.0, %v2766_v13 }
 0x208   :  { %v1458_v32 = vadd.f32 %v2244_v60, %v1457_v38 }
 0x209   :  { %v1370_v40 = vadd.f32 %v1369_v21, %v1299_v8  ;;  %2473 = vst [vmem:[#allocation11 + $0xd0] sm:$0xff] %v2431_v24   ;;  %v2531_v21 = vld [vmem:[#allocation4 + $0x70] sm:$0xff] }
 0x20a   :  { %v3286_v45 = vpop.f32.mrf.mxu3 }
 0x20b   :  { %1196 = vst [vmem:[#allocation10 + $0x128] sm:$0xff] %v3286_v45 }
 0x20c   :  { %v1006_v47 = vpop.f32.mrf.mxu1  ;;  %v543_v49 = vpop.xlane.xlu0 %542 }
 0x20d   :  { %1172 = vst [vmem:[#allocation10 + $0x68] sm:$0xff] %v1006_v47  ;;  %v1236_v59 = vsub.f32 %v1006_v47, %v2530_v57  ;;  %v593_v58 = vpop.xlane.xlu1 %592  ;;  %vm643_vm3 = vcmp.eq.s32.totalorder %v2887_v43, %v543_v49  ;;  %v2532_v49 = vld [vmem:[#allocation4 + $0x78] sm:$0xff] }
 0x20e   :  { %vm668_vm4 = vcmp.eq.s32.totalorder %v2887_v43, %v593_v58  ;;  %v2245_v5 = vsel %vm643_vm3, 1.0, %v2766_v13 }
 0x20f   :  { %v1300_v62 = vmul.f32 %v1236_v59, %v1236_v59  ;;  %v2395_v1 = vpack.c.bf16 %v2245_v5, %v2244_v60  ;;  %2309 = vmatmul.msk.f32.gmra.mxu1 %vm643_vm3, %v2767_v48  ;;  %2334 = vmatmul.msk.f32.gmra.mxu3 %vm668_vm4, %v2767_v48  ;;  %v3311_v35 = vsel %vm668_vm4, 1.0, %v2766_v13 }
 0x211   :  { %v1371_v3 = vadd.f32 %v1370_v40, %v1300_v62  ;;  %2461 = vst [vmem:[#allocation11 + $0x70] sm:$0xff] %v2395_v1   ;;  %v1459_v40 = vadd.f32 %v2245_v5, %v1458_v32 }
 0x212   :  { %v3303_v4 = vpop.f32.mrf.mxu3 }
 0x213   :  { %1197 = vst [vmem:[#allocation10 + $0x130] sm:$0xff] %v3303_v4 }
 0x214   :  { %v1009_v19 = vpop.f32.mrf.mxu1  ;;  %v595_v39 = vpop.xlane.xlu0 %594 }
 0x215   :  { %1173 = vst [vmem:[#allocation10 + $0x70] sm:$0xff] %v1009_v19  ;;  %v1237_v25 = vsub.f32 %v1009_v19, %v2531_v21  ;;  %vm669_vm5 = vcmp.eq.s32.totalorder %v2887_v43, %v595_v39  ;;  %v545_v26 = vpop.xlane.xlu2 %544 }
 0x216   :  { %v3314_v28 = vsel %vm669_vm5, 1.0, %v2766_v13  ;;  %vm644_vm6 = vcmp.eq.s32.totalorder %v2887_v43, %v545_v26  ;;  %v2533_v26 = vld [vmem:[#allocation4 + $0x80] sm:$0xff] }
 0x217   :  { %v1301_v29 = vmul.f32 %v1237_v25, %v1237_v25  ;;  %v2434_v12 = vpack.c.bf16 %v3314_v28, %v3311_v35  ;;  %2310 = vmatmul.msk.f32.gmra.mxu1 %vm644_vm6, %v2767_v48  ;;  %2335 = vmatmul.msk.f32.gmra.mxu3 %vm669_vm5, %v2767_v48  ;;  %v2246_v24 = vsel %vm644_vm6, 1.0, %v2766_v13 }
 0x218   :  { %v1460_v47 = vadd.f32 %v2246_v24, %v1459_v40 }
 0x219   :  { %v1372_v8 = vadd.f32 %v1371_v3, %v1301_v29  ;;  %2474 = vst [vmem:[#allocation11 + $0xd8] sm:$0xff] %v2434_v12  }
 0x21a   :  { %v3322_v37 = vpop.f32.mrf.mxu3 }
 0x21b   :  { %1198 = vst [vmem:[#allocation10 + $0x138] sm:$0xff] %v3322_v37 }
 0x21c   :  { %v1012_v46 = vpop.f32.mrf.mxu1  ;;  %v547_v14 = vpop.xlane.xlu1 %546 }
 0x21d   :  { %1174 = vst [vmem:[#allocation10 + $0x78] sm:$0xff] %v1012_v46  ;;  %v1238_v50 = vsub.f32 %v1012_v46, %v2532_v49  ;;  %v597_v57 = vpop.xlane.xlu2 %596  ;;  %vm645_vm7 = vcmp.eq.s32.totalorder %v2887_v43, %v547_v14  ;;  %v599_v59 = vpop.xlane.xlu0 %598 }
 0x21e   :  { %vm670_vm8 = vcmp.eq.s32.totalorder %v2887_v43, %v597_v57  ;;  %v2247_v58 = vsel %vm645_vm7, 1.0, %v2766_v13  ;;  %vm671_vm9 = vcmp.eq.s32.totalorder %v2887_v43, %v599_v59 }
 0x21f   :  { %v1302_v60 = vmul.f32 %v1238_v50, %v1238_v50  ;;  %v3330_v5 = vsel %vm670_vm8, 1.0, %v2766_v13  ;;  %v2398_v6 = vpack.c.bf16 %v2247_v58, %v2246_v24  ;;  %v1461_v62 = vadd.f32 %v2247_v58, %v1460_v47  ;;  %2311 = vmatmul.msk.f32.gmra.mxu1 %vm645_vm7, %v2767_v48  ;;  %2336 = vmatmul.msk.f32.gmra.mxu3 %vm670_vm8, %v2767_v48 }
 0x220   :  { %v3337_v1 = vsel %vm671_vm9, 1.0, %v2766_v13 }
 0x221   :  { %v1373_v36 = vadd.f32 %v1372_v8, %v1302_v60  ;;  %2462 = vst [vmem:[#allocation11 + $0x78] sm:$0xff] %v2398_v6   ;;  %v1462_v3 = vadd.f32 %v2955_v52, %v1461_v62  ;;  %v2437_v11 = vpack.c.bf16 %v3337_v1, %v3330_v5 }
 0x222   :  { %v3342_v19 = vpop.f32.mrf.mxu3 }
 0x223   :  { %v1463_v39 = vadd.f32 %v2958_v53, %v1462_v3  ;;  %2475 = vst [vmem:[#allocation11 + $0xe0] sm:$0xff] %v2437_v11  }
 0x224   :  { %1199 = vst [vmem:[#allocation10 + $0x140] sm:$0xff] %v3342_v19  ;;  %v1015_v20 = vpop.f32.mrf.mxu1  ;;  %v601_v21 = vpop.xlane.xlu1 %600 }
 0x225   :  { %v1464_v25 = vadd.f32 %v2987_v9, %v1463_v39  ;;  %1175 = vst [vmem:[#allocation10 + $0x80] sm:$0xff] %v1015_v20  ;;  %v1239_v38 = vsub.f32 %v1015_v20, %v2533_v26  ;;  %vm672_vm10 = vcmp.eq.s32.totalorder %v2887_v43, %v601_v21  ;;  %v603_v52 = vpop.xlane.xlu2 %602  ;;  %v605_v32 = vpop.xlane.xlu0 %604 }
 0x226   :  { %v3351_v29 = vsel %vm672_vm10, 1.0, %v2766_v13  ;;  %vm673_vm11 = vcmp.eq.s32.totalorder %v2887_v43, %v603_v52  ;;  %vm674_vm12 = vcmp.eq.s32.totalorder %v2887_v43, %v605_v32 }
 0x227   :  { %v1465_v53 = vadd.f32 %v2990_v10, %v1464_v25  ;;  %v1303_v12 = vmul.f32 %v1239_v38, %v1239_v38  ;;  %2337 = vmatmul.msk.f32.gmra.mxu3 %vm671_vm9, %v2767_v48  ;;  %v3361_v9 = vsel %vm673_vm11, 1.0, %v2766_v13  ;;  %v3374_v47 = vsel %vm674_vm12, 1.0, %v2766_v13  ;;  %v2535_v25 = vld [vmem:[#allocation4 + $0x90] sm:$0xff] }
 0x228   :  { %v2440_v8 = vpack.c.bf16 %v3361_v9, %v3351_v29 }
 0x229   :  { %v1466_v24 = vadd.f32 %v3019_v30, %v1465_v53  ;;  %v1374_v40 = vadd.f32 %v1373_v36, %v1303_v12  ;;  %v2534_v30 = vld [vmem:[#allocation4 + $0x88] sm:$0xff] }
 0x22a   :  { %v3366_v46 = vpop.f32.mrf.mxu3  ;;  %2476 = vst [vmem:[#allocation11 + $0xe8] sm:$0xff] %v2440_v8  }
 0x22b   :  { %v1467_v10 = vadd.f32 %v3022_v31, %v1466_v24  ;;  %1200 = vst [vmem:[#allocation10 + $0x148] sm:$0xff] %v3366_v46 }
 0x22c   :  { %v1018_v14 = vpop.f32.mrf.mxu1  ;;  %v607_v49 = vpop.xlane.xlu1 %606 }
 0x22d   :  { %v1468_v50 = vadd.f32 %v3051_v54, %v1467_v10  ;;  %1176 = vst [vmem:[#allocation10 + $0x88] sm:$0xff] %v1018_v14  ;;  %v1240_v57 = vsub.f32 %v1018_v14, %v2534_v30  ;;  %vm675_vm13 = vcmp.eq.s32.totalorder %v2887_v43, %v607_v49  ;;  %v3378_v59 = vpop.xlane.xlu2 %608  ;;  %v3391_v6 = vpop.xlane.xlu0 %610 }
 0x22e   :  { %v3383_v31 = vsel %vm675_vm13, 1.0, %v2766_v13  ;;  %vm676_vm14 = vcmp.eq.s32.totalorder %v2887_v43, %v3378_v59  ;;  %vm677_vm15 = vcmp.eq.s32.totalorder %v2887_v43, %v3391_v6 }
 0x22f   :  { %v1469_v58 = vadd.f32 %v3054_v55, %v1468_v50  ;;  %v1304_v60 = vmul.f32 %v1240_v57, %v1240_v57  ;;  %2338 = vmatmul.msk.f32.gmra.mxu3 %vm672_vm10, %v2767_v48  ;;  %v2443_v54 = vpack.c.bf16 %v3383_v31, %v3374_v47  ;;  %v3402_v55 = vsel %vm676_vm14, 1.0, %v2766_v13  ;;  %v2537_v57 = vld [vmem:[#allocation4 + $0xa0] sm:$0xff] }
 0x230   :  { %v3408_v3 = vsel %vm677_vm15, 1.0, %v2766_v13 }
 0x231   :  { %v1470_v62 = vadd.f32 %v3083_v15, %v1469_v58  ;;  %v1375_v36 = vadd.f32 %v1374_v40, %v1304_v60  ;;  %2477 = vst [vmem:[#allocation11 + $0xf0] sm:$0xff] %v2443_v54   ;;  %v2446_v39 = vpack.c.bf16 %v3408_v3, %v3402_v55  ;;  %v2536_v40 = vld [vmem:[#allocation4 + $0x98] sm:$0xff] }
 0x232   :  { %v3410_v11 = vpop.f32.mrf.mxu3 }
 0x233   :  { %v1471_v15 = vadd.f32 %v3086_v16, %v1470_v62  ;;  %1201 = vst [vmem:[#allocation10 + $0x150] sm:$0xff] %v3410_v11 }
 0x234   :  { %v1021_v20 = vpop.f32.mrf.mxu1  ;;  %2478 = vst [vmem:[#allocation11 + $0xf8] sm:$0xff] %v2446_v39  }
 0x235   :  { %v1472_v21 = vadd.f32 %v3120_v41, %v1471_v15  ;;  %1177 = vst [vmem:[#allocation10 + $0x90] sm:$0xff] %v1021_v20  ;;  %v1241_v26 = vsub.f32 %v1021_v20, %v2535_v25  ;;  %2140 = dma.vmem_to_hbm [thread:$0]  %s2133_s22, 4096, %s2135_s20, [#allocation12], %s2760_s9, %s2760_s9, %s2761_s10  }
 0x237   :  { %v1473_v38 = vadd.f32 %v3123_v42, %v1472_v21  ;;  %v1305_v13 = vmul.f32 %v1241_v26, %v1241_v26  ;;  %2339 = vmatmul.msk.f32.gmra.mxu3 %vm673_vm11, %v2767_v48 }
 0x239   :  { %v1474_v53 = vadd.f32 %v3141_v63, %v1473_v38  ;;  %v1376_v12 = vadd.f32 %v1375_v36, %v1305_v13 }
 0x23a   :  { %v3422_v16 = vpop.f32.mrf.mxu3 }
 0x23b   :  { %v1475_v8 = vadd.f32 %v3144_v0, %v1474_v53  ;;  %1202 = vst [vmem:[#allocation10 + $0x158] sm:$0xff] %v3422_v16 }
 0x23c   :  { %v1024_v41 = vpop.f32.mrf.mxu1 }
 0x23d   :  { %v1476_v24 = vadd.f32 %v3165_v17, %v1475_v8  ;;  %1178 = vst [vmem:[#allocation10 + $0x98] sm:$0xff] %v1024_v41  ;;  %v1242_v42 = vsub.f32 %v1024_v41, %v2536_v40  ;;  %v2538_v40 = vld [vmem:[#allocation4 + $0xa8] sm:$0xff] }
 0x23f   :  { %v1477_v10 = vadd.f32 %v3168_v18, %v1476_v24  ;;  %v1306_v14 = vmul.f32 %v1242_v42, %v1242_v42  ;;  %2340 = vmatmul.msk.f32.gmra.mxu3 %vm674_vm12, %v2767_v48 }
 0x241   :  { %v1478_v63 = vadd.f32 %v3202_v2, %v1477_v10  ;;  %v1377_v52 = vadd.f32 %v1376_v12, %v1306_v14  ;;  %v2539_v10 = vld [vmem:[#allocation4 + $0xb0] sm:$0xff] }
 0x242   :  { %v3432_v50 = vpop.f32.mrf.mxu3 }
 0x243   :  { %v1479_v0 = vadd.f32 %v3205_v7, %v1478_v63  ;;  %1203 = vst [vmem:[#allocation10 + $0x160] sm:$0xff] %v3432_v50 }
 0x244   :  { %v1027_v17 = vpop.f32.mrf.mxu1 }
 0x245   :  { %v1480_v30 = vadd.f32 %v3240_v51, %v1479_v0  ;;  %1179 = vst [vmem:[#allocation10 + $0xa0] sm:$0xff] %v1027_v17  ;;  %v1243_v18 = vsub.f32 %v1027_v17, %v2537_v57  ;;  %v2541_v57 = vld [vmem:[#allocation4 + $0xc0] sm:$0xff] }
 0x247   :  { %v1481_v58 = vadd.f32 %v3243_v56, %v1480_v30  ;;  %v1307_v60 = vmul.f32 %v1243_v18, %v1243_v18  ;;  %2341 = vmatmul.msk.f32.gmra.mxu3 %vm675_vm13, %v2767_v48 }
 0x249   :  { %v1482_v2 = vadd.f32 %v3272_v33, %v1481_v58  ;;  %v3442_v32 = vadd.f32 %v1377_v52, %v1307_v60  ;;  %v2540_v52 = vld [vmem:[#allocation4 + $0xb8] sm:$0xff] }
 0x24a   :  { %v3444_v7 = vpop.f32.mrf.mxu3 }
 0x24b   :  { %v1483_v54 = vadd.f32 %v3275_v34, %v1482_v2  ;;  %1204 = vst [vmem:[#allocation10 + $0x168] sm:$0xff] %v3444_v7 }
 0x24c   :  { %v3448_v51 = vpop.f32.mrf.mxu1 }
 0x24d   :  { %v1484_v62 = vadd.f32 %v3311_v35, %v1483_v54  ;;  %1180 = vst [vmem:[#allocation10 + $0xa8] sm:$0xff] %v3448_v51  ;;  %v1244_v42 = vsub.f32 %v3448_v51, %v2538_v40  ;;  %v2542_v54 = vld [vmem:[#allocation4 + $0xc8] sm:$0xff] }
 0x24f   :  { %v1485_v56 = vadd.f32 %v3314_v28, %v1484_v62  ;;  %2342 = vmatmul.msk.f32.gmra.mxu3 %vm676_vm14, %v2767_v48  ;;  %v1308_v63 = vmul.f32 %v1244_v42, %v1244_v42  ;;  %v2548_v42 = vld [vmem:[#allocation4 + $0x100] sm:$0xff] }
 0x251   :  { %v1486_v33 = vadd.f32 %v3330_v5, %v1485_v56  ;;  %v1379_v60 = vadd.f32 %v3442_v32, %v1308_v63  ;;  %v2549_v63 = vld [vmem:[#allocation4 + $0xf8] sm:$0xff] }
 0x252   :  { %v3458_v49 = vpop.f32.mrf.mxu3 }
 0x253   :  { %v1487_v34 = vadd.f32 %v3337_v1, %v1486_v33  ;;  %1205 = vst [vmem:[#allocation10 + $0x170] sm:$0xff] %v3458_v49  ;;  %v2543_v33 = vld [vmem:[#allocation4 + $0xd0] sm:$0xff] }
 0x254   :  { %v1033_v36 = vpop.f32.mrf.mxu1 }
 0x255   :  { %v1488_v35 = vadd.f32 %v3351_v29, %v1487_v34  ;;  %1181 = vst [vmem:[#allocation10 + $0xb0] sm:$0xff] %v1033_v36  ;;  %v1245_v14 = vsub.f32 %v1033_v36, %v2539_v10  ;;  %v1255_v10 = vsub.f32 %v3179_v27, %v2548_v42 }
 0x257   :  { %v1489_v39 = vadd.f32 %v3361_v9, %v1488_v35  ;;  %2343 = vmatmul.msk.f32.gmra.mxu3 %vm677_vm15, %v2767_v48  ;;  %v1309_v30 = vmul.f32 %v1245_v14, %v1245_v14 }
 0x259   :  { %v1490_v28 = vadd.f32 %v3374_v47, %v1489_v39  ;;  %v1380_v51 = vadd.f32 %v1379_v60, %v1309_v30  ;;  %v2544_v39 = vld [vmem:[#allocation4 + $0xd8] sm:$0xff]  ;;  %v2551_v60 = vld [vmem:[#allocation4 + $0x110] sm:$0xff] }
 0x25a   :  { %v3469_v5 = vpop.f32.mrf.mxu3 }
 0x25b   :  { %v1491_v59 = vadd.f32 %v3383_v31, %v1490_v28  ;;  %1206 = vst [vmem:[#allocation10 + $0x178] sm:$0xff] %v3469_v5  ;;  %v1430_v31 = vld [vmem:[#allocation3] sm:$0x1] }
 0x25c   :  { %v1036_v1 = vpop.f32.mrf.mxu1 }
 0x25d   :  { %v1492_v15 = vadd.f32 %v3402_v55, %v1491_v59  ;;  %1182 = vst [vmem:[#allocation10 + $0xb8] sm:$0xff] %v1036_v1  ;;  %v1246_v0 = vsub.f32 %v1036_v1, %v2540_v52 }
 0x25f   :  { %v1493_v29 = vadd.f32 %v3408_v3, %v1492_v15  ;;  %v1310_v2 = vmul.f32 %v1246_v0, %v1246_v0  ;;  %v2550_v0 = vld [vmem:[#allocation4 + $0x108] sm:$0xff] }
 0x260   :  { %v1256_v30 = vsub.f32 %v3214_v22, %v2550_v0 }
 0x261   :  { %v1494_v9 = vrot.slane %v1493_v29, 4  ;;  %v1381_v36 = vadd.f32 %v1380_v51, %v1310_v2  ;;  %v1257_v2 = vsub.f32 %v3233_v44, %v2551_v60  ;;  %v2563_v60 = vld [vmem:[#allocation4 + $0x170] sm:$0xff] }
 0x262   :  { %v3475_v20 = vpop.f32.mrf.mxu3  ;;  %v1320_v51 = vmul.f32 %v1256_v30, %v1256_v30 }
 0x263   :  { %v1495_v21 = vadd.f32 %v1494_v9, %v1493_v29  ;;  %1207 = vst [vmem:[#allocation10 + $0x180] sm:$0xff] %v3475_v20  ;;  %v2545_v29 = vld [vmem:[#allocation4 + $0xe0] sm:$0xff] }
 0x264   :  { %v1039_v43 = vpop.f32.mrf.mxu1 }
 0x265   :  { %v1496_v48 = vrot.slane %v1495_v21, 2  ;;  %1183 = vst [vmem:[#allocation10 + $0xc0] sm:$0xff] %v1039_v43  ;;  %v1247_v18 = vsub.f32 %v1039_v43, %v2541_v57 }
 0x267   :  { %v1497_v47 = vadd.f32 %v1496_v48, %v1495_v21  ;;  %v1311_v56 = vmul.f32 %v1247_v18, %v1247_v18  ;;  %v2546_v48 = vld [vmem:[#allocation4 + $0xe8] sm:$0xff] }
 0x269   :  { %v1498_v6 = vrot.slane %v1497_v47, 1  ;;  %v1382_v1 = vadd.f32 %v1381_v36, %v1311_v56  ;;  %v2552_v56 = vld [vmem:[#allocation4 + $0x118] sm:$0xff]  ;;  %v2553_v36 = vld [vmem:[#allocation4 + $0x120] sm:$0xff] }
 0x26a   :  { %v3478_v25 = vpop.f32.mrf.mxu3  ;;  %v1258_v27 = vsub.f32 %v3252_v61, %v2552_v56  ;;  %v1259_v22 = vsub.f32 %v3265_v23, %v2553_v36  ;;  %v2564_v56 = vld [vmem:[#allocation4 + $0x178] sm:$0xff] }
 0x26b   :  { %v1499_v26 = vadd.f32 %v1498_v6, %v1497_v47  ;;  %1208 = vst [vmem:[#allocation10 + $0x188] sm:$0xff] %v3478_v25 }
 0x26c   :  { %v1042_v55 = vpop.f32.mrf.mxu1 }
 0x26d   :  { %v1500_v38 = vadd.f32 %v1499_v26, %v1430_v31  ;;  %1184 = vst [vmem:[#allocation10 + $0xc8] sm:$0xff] %v1042_v55  ;;  %v1248_v62 = vsub.f32 %v1042_v55, %v2542_v54  ;;  %v2547_v26 = vld [vmem:[#allocation4 + $0xf0] sm:$0xff] }
 0x26f   :  { %1501 = vst [vmem:[#allocation3] sm:$0x1] %v1500_v38  ;;  %v1312_v35 = vmul.f32 %v1248_v62, %v1248_v62 }
 0x271   :  { %v1383_v21 = vadd.f32 %v1382_v1, %v1312_v35 }
 0x272   :  { %v3484_v3 = vpop.f32.mrf.mxu3 }
 0x273   :  { %1209 = vst [vmem:[#allocation10 + $0x190] sm:$0xff] %v3484_v3 }
 0x274   :  { %v1045_v13 = vpop.f32.mrf.mxu1 }
 0x275   :  { %1185 = vst [vmem:[#allocation10 + $0xd0] sm:$0xff] %v1045_v13  ;;  %v1249_v34 = vsub.f32 %v1045_v13, %v2543_v33 }
 0x276   :  { %v2105_v53 = vld [vmem:[#allocation3] sm:$0x1] }
 0x277   :  { %2106 = vst [vmem:[#allocation14] sm:$0x1] %v2105_v53  ;;  %v1313_v15 = vmul.f32 %v1249_v34, %v1249_v34  ;;  %v1321_v34 = vmul.f32 %v1257_v2, %v1257_v2  ;;  %v1269_v2 = vsub.f32 %v3458_v49, %v2563_v60  ;;  %v2567_v49 = vld [vmem:[#allocation4 + $0x190] sm:$0xff] }
 0x278   :  { %2162 = dma.vmem_to_hbm [thread:$0]  %s2158_s5, 16, %s2160_s26, [#allocation15]  }
 0x279   :  { %v1384_v6 = vadd.f32 %v1383_v21, %v1313_v15  ;;  %v1323_v15 = vmul.f32 %v1259_v22, %v1259_v22 }
 0x27a   :  { %v3490_v12 = vpop.f32.mrf.mxu3 }
 0x27b   :  { %1210 = vst [vmem:[#allocation10 + $0x198] sm:$0xff] %v3490_v12 }
 0x27c   :  { %v1048_v8 = vpop.f32.mrf.mxu1 }
 0x27d   :  { %1186 = vst [vmem:[#allocation10 + $0xd8] sm:$0xff] %v1048_v8  ;;  %v1250_v28 = vsub.f32 %v1048_v8, %v2544_v39  ;;  %v1322_v39 = vmul.f32 %v1258_v27, %v1258_v27  ;;  %v1270_v27 = vsub.f32 %v3469_v5, %v2564_v56  ;;  %v2568_v5 = vld [vmem:[#allocation4 + $0x198] sm:$0xff] }
 0x27f   :  { %v1314_v43 = vmul.f32 %v1250_v28, %v1250_v28  ;;  %v2554_v28 = vld [vmem:[#allocation4 + $0x128] sm:$0xff] }
 0x280   :  { %v1260_v1 = vsub.f32 %v3286_v45, %v2554_v28 }
 0x281   :  { %v1385_v38 = vadd.f32 %v1384_v6, %v1314_v43  ;;  %v2556_v43 = vld [vmem:[#allocation4 + $0x138] sm:$0xff]  ;;  %v2557_v6 = vld [vmem:[#allocation4 + $0x140] sm:$0xff] }
 0x282   :  { %v3496_v41 = vpop.f32.mrf.mxu3  ;;  %v1324_v61 = vmul.f32 %v1260_v1, %v1260_v1 }
 0x283   :  { %1211 = vst [vmem:[#allocation10 + $0x1a0] sm:$0xff] %v3496_v41 }
 0x284   :  { %v1051_v24 = vpop.f32.mrf.mxu1 }
 0x285   :  { %1187 = vst [vmem:[#allocation10 + $0xe0] sm:$0xff] %v1051_v24  ;;  %v1251_v9 = vsub.f32 %v1051_v24, %v2545_v29  ;;  %v2555_v29 = vld [vmem:[#allocation4 + $0x130] sm:$0xff] }
 0x287   :  { %v1315_v31 = vmul.f32 %v1251_v9, %v1251_v9  ;;  %v1261_v9 = vsub.f32 %v3303_v4, %v2555_v29 }
 0x289   :  { %v1386_v8 = vadd.f32 %v1385_v38, %v1315_v31  ;;  %v1325_v23 = vmul.f32 %v1261_v9, %v1261_v9  ;;  %v1263_v31 = vsub.f32 %v3342_v19, %v2557_v6 }
 0x28a   :  { %v3500_v17 = vpop.f32.mrf.mxu3 }
 0x28b   :  { %1212 = vst [vmem:[#allocation10 + $0x1a8] sm:$0xff] %v3500_v17 }
 0x28c   :  { %v1054_v58 = vpop.f32.mrf.mxu1 }
 0x28d   :  { %1188 = vst [vmem:[#allocation10 + $0xe8] sm:$0xff] %v1054_v58  ;;  %v1252_v47 = vsub.f32 %v1054_v58, %v2546_v48  ;;  %v1319_v58 = vmul.f32 %v1255_v10, %v1255_v10  ;;  %v1262_v48 = vsub.f32 %v3322_v37, %v2556_v43  ;;  %v2560_v10 = vld [vmem:[#allocation4 + $0x158] sm:$0xff] }
 0x28f   :  { %v1316_v13 = vmul.f32 %v1252_v47, %v1252_v47 }
 0x291   :  { %v1387_v14 = vadd.f32 %v1386_v8, %v1316_v13  ;;  %v1327_v13 = vmul.f32 %v1263_v31, %v1263_v31  ;;  %v2559_v8 = vld [vmem:[#allocation4 + $0x150] sm:$0xff] }
 0x292   :  { %v3504_v59 = vpop.f32.mrf.mxu3 }
 0x293   :  { %1213 = vst [vmem:[#allocation10 + $0x1b0] sm:$0xff] %v3504_v59 }
 0x294   :  { %v1057_v32 = vpop.f32.mrf.mxu1 }
 0x295   :  { %1189 = vst [vmem:[#allocation10 + $0xf0] sm:$0xff] %v1057_v32  ;;  %v1253_v55 = vsub.f32 %v1057_v32, %v2547_v26  ;;  %v1326_v26 = vmul.f32 %v1262_v48, %v1262_v48 }
 0x297   :  { %v1317_v40 = vmul.f32 %v1253_v55, %v1253_v55  ;;  %v2558_v55 = vld [vmem:[#allocation4 + $0x148] sm:$0xff] }
 0x298   :  { %v1264_v38 = vsub.f32 %v3366_v46, %v2558_v55 }
 0x299   :  { %v1388_v57 = vadd.f32 %v1387_v14, %v1317_v40  ;;  %v1265_v40 = vsub.f32 %v3410_v11, %v2559_v8  ;;  %v1266_v14 = vsub.f32 %v3422_v16, %v2560_v10 }
 0x29a   :  { %v3507_v53 = vpop.f32.mrf.mxu3  ;;  %v1328_v37 = vmul.f32 %v1264_v38, %v1264_v38 }
 0x29b   :  { %1214 = vst [vmem:[#allocation10 + $0x1b8] sm:$0xff] %v3507_v53  ;;  %v1329_v19 = vmul.f32 %v1265_v40, %v1265_v40  ;;  %v1330_v30 = vmul.f32 %v1266_v14, %v1266_v14  ;;  %v2574_v14 = vld [vmem:[#allocation4 + $0x1c8] sm:$0xff] }
 0x29c   :  { %v1060_v24 = vpop.f32.mrf.mxu1 }
 0x29d   :  { %1190 = vst [vmem:[#allocation10 + $0xf8] sm:$0xff] %v1060_v24  ;;  %v1254_v52 = vsub.f32 %v1060_v24, %v2549_v63 }
 0x29f   :  { %v1318_v18 = vmul.f32 %v1254_v52, %v1254_v52  ;;  %v2561_v52 = vld [vmem:[#allocation4 + $0x160] sm:$0xff] }
 0x2a0   :  { %v1267_v0 = vsub.f32 %v3432_v50, %v2561_v52  ;;  %v2565_v50 = vld [vmem:[#allocation4 + $0x180] sm:$0xff]  ;;  %v2575_v52 = vld [vmem:[#allocation4 + $0x1d0] sm:$0xff] }
 0x2a1   :  { %v1389_v54 = vadd.f32 %v1388_v57, %v1318_v18  ;;  %v2562_v57 = vld [vmem:[#allocation4 + $0x168] sm:$0xff]  ;;  %v1271_v36 = vsub.f32 %v3475_v20, %v2565_v50  ;;  %v2569_v20 = vld [vmem:[#allocation4 + $0x1a0] sm:$0xff] }
 0x2a2   :  { %v3513_v62 = vpop.f32.mrf.mxu3  ;;  %v1268_v18 = vsub.f32 %v3444_v7, %v2562_v57  ;;  %v2566_v7 = vld [vmem:[#allocation4 + $0x188] sm:$0xff]  ;;  %v1275_v48 = vsub.f32 %v3496_v41, %v2569_v20  ;;  %v2573_v41 = vld [vmem:[#allocation4 + $0x1c0] sm:$0xff]  ;;  %v2576_v57 = vld [vmem:[#allocation4 + $0x1d8] sm:$0xff] }
 0x2a3   :  { %v1390_v33 = vadd.f32 %v1389_v54, %v1319_v58  ;;  %1215 = vst [vmem:[#allocation10 + $0x1c0] sm:$0xff] %v3513_v62  ;;  %v1331_v58 = vmul.f32 %v1267_v0, %v1267_v0  ;;  %v1335_v1 = vmul.f32 %v1271_v36, %v1271_v36  ;;  %v2580_v36 = vld [vmem:[#allocation4 + $0x1f8] sm:$0xff] }
 0x2a4   :  { %v1332_v16 = vmul.f32 %v1268_v18, %v1268_v18 }
 0x2a5   :  { %v1391_v35 = vadd.f32 %v1390_v33, %v1320_v51 }
 0x2a7   :  { %v1392_v44 = vadd.f32 %v1391_v35, %v1321_v34  ;;  %v1333_v34 = vmul.f32 %v1269_v2, %v1269_v2  ;;  %v1334_v35 = vmul.f32 %v1270_v27, %v1270_v27  ;;  %v2579_v27 = vld [vmem:[#allocation4 + $0x1f0] sm:$0xff] }
 0x2a9   :  { %v1393_v32 = vadd.f32 %v1392_v44, %v1322_v39  ;;  %v1272_v39 = vsub.f32 %v3478_v25, %v2566_v7  ;;  %v1273_v44 = vsub.f32 %v3484_v3, %v2567_v49  ;;  %v2570_v25 = vld [vmem:[#allocation4 + $0x1a8] sm:$0xff]  ;;  %v2571_v3 = vld [vmem:[#allocation4 + $0x1b0] sm:$0xff] }
 0x2aa   :  { %v3520_v21 = vpop.f32.mrf.mxu3  ;;  %v1276_v6 = vsub.f32 %v3500_v17, %v2570_v25 }
 0x2ab   :  { %v1394_v47 = vadd.f32 %v1393_v32, %v1323_v15  ;;  %1216 = vst [vmem:[#allocation10 + $0x1c8] sm:$0xff] %v3520_v21  ;;  %v1336_v9 = vmul.f32 %v1272_v39, %v1272_v39  ;;  %v1274_v32 = vsub.f32 %v3490_v12, %v2568_v5  ;;  %v1337_v43 = vmul.f32 %v1273_v44, %v1273_v44  ;;  %v2572_v12 = vld [vmem:[#allocation4 + $0x1b8] sm:$0xff] }
 0x2ac   :  { %v1358_v5 = vld [vmem:[#allocation2] sm:$0x1] }
 0x2ad   :  { %v1395_v45 = vadd.f32 %v1394_v47, %v1324_v61 }
 0x2af   :  { %v1396_v4 = vadd.f32 %v1395_v45, %v1325_v23  ;;  %v1338_v23 = vmul.f32 %v1274_v32, %v1274_v32  ;;  %v1339_v45 = vmul.f32 %v1275_v48, %v1275_v48 }
 0x2b1   :  { %v1397_v24 = vadd.f32 %v1396_v4, %v1326_v26  ;;  %v1277_v26 = vsub.f32 %v3504_v59, %v2571_v3  ;;  %v1340_v4 = vmul.f32 %v1276_v6, %v1276_v6 }
 0x2b2   :  { %v3527_v42 = vpop.f32.mrf.mxu3 }
 0x2b3   :  { %v1398_v63 = vadd.f32 %v1397_v24, %v1327_v13  ;;  %1217 = vst [vmem:[#allocation10 + $0x1d0] sm:$0xff] %v3527_v42  ;;  %v1278_v13 = vsub.f32 %v3507_v53, %v2572_v12  ;;  %v1341_v40 = vmul.f32 %v1277_v26, %v1277_v26  ;;  %v1279_v24 = vsub.f32 %v3513_v62, %v2573_v41  ;;  %v2577_v62 = vld [vmem:[#allocation4 + $0x1e0] sm:$0xff] }
 0x2b4   :  { %v1281_v0 = vsub.f32 %v3527_v42, %v2575_v52 }
 0x2b5   :  { %v1399_v46 = vadd.f32 %v1398_v63, %v1328_v37  ;;  %v1342_v10 = vmul.f32 %v1278_v13, %v1278_v13  ;;  %v1280_v63 = vsub.f32 %v3520_v21, %v2574_v14 }
 0x2b7   :  { %v1400_v11 = vadd.f32 %v1399_v46, %v1329_v19  ;;  %v1343_v19 = vmul.f32 %v1279_v24, %v1279_v24  ;;  %v1344_v53 = vmul.f32 %v1280_v63, %v1280_v63 }
 0x2b9   :  { %v1401_v54 = vadd.f32 %v1400_v11, %v1330_v30 }
 0x2ba   :  { %v1144_v51 = vpop.f32.mrf.mxu3 }
 0x2bb   :  { %v1402_v33 = vadd.f32 %v1401_v54, %v1331_v58  ;;  %1218 = vst [vmem:[#allocation10 + $0x1d8] sm:$0xff] %v1144_v51  ;;  %v1282_v18 = vsub.f32 %v1144_v51, %v2576_v57  ;;  %v1345_v58 = vmul.f32 %v1281_v0, %v1281_v0  ;;  %v2578_v54 = vld [vmem:[#allocation4 + $0x1e8] sm:$0xff] }
 0x2bd   :  { %v1403_v22 = vadd.f32 %v1402_v33, %v1332_v16  ;;  %v1346_v2 = vmul.f32 %v1282_v18, %v1282_v18 }
 0x2bf   :  { %v1404_v28 = vadd.f32 %v1403_v22, %v1333_v34 }
 0x2c1   :  { %v1405_v15 = vadd.f32 %v1404_v28, %v1334_v35 }
 0x2c2   :  { %v1147_v29 = vpop.f32.mrf.mxu3 }
 0x2c3   :  { %v1406_v61 = vadd.f32 %v1405_v15, %v1335_v1  ;;  %1219 = vst [vmem:[#allocation10 + $0x1e0] sm:$0xff] %v1147_v29  ;;  %v1283_v60 = vsub.f32 %v1147_v29, %v2577_v62 }
 0x2c5   :  { %v1407_v47 = vadd.f32 %v1406_v61, %v1336_v9  ;;  %v1347_v56 = vmul.f32 %v1283_v60, %v1283_v60 }
 0x2c7   :  { %v1408_v31 = vadd.f32 %v1407_v47, %v1337_v43 }
 0x2c9   :  { %v1409_v55 = vadd.f32 %v1408_v31, %v1338_v23 }
 0x2ca   :  { %v1150_v38 = vpop.f32.mrf.mxu3 }
 0x2cb   :  { %v1410_v8 = vadd.f32 %v1409_v55, %v1339_v45  ;;  %1220 = vst [vmem:[#allocation10 + $0x1e8] sm:$0xff] %v1150_v38  ;;  %v1284_v42 = vsub.f32 %v1150_v38, %v2578_v54 }
 0x2cd   :  { %v1411_v37 = vadd.f32 %v1410_v8, %v1340_v4  ;;  %v1348_v50 = vmul.f32 %v1284_v42, %v1284_v42 }
 0x2cf   :  { %v1412_v17 = vadd.f32 %v1411_v37, %v1341_v40 }
 0x2d1   :  { %v1413_v59 = vadd.f32 %v1412_v17, %v1342_v10 }
 0x2d2   :  { %v1153_v46 = vpop.f32.mrf.mxu3 }
 0x2d3   :  { %v1414_v30 = vadd.f32 %v1413_v59, %v1343_v19  ;;  %1221 = vst [vmem:[#allocation10 + $0x1f0] sm:$0xff] %v1153_v46  ;;  %v1285_v33 = vsub.f32 %v1153_v46, %v2579_v27 }
 0x2d5   :  { %v1415_v11 = vadd.f32 %v1414_v30, %v1344_v53  ;;  %v1349_v7 = vmul.f32 %v1285_v33, %v1285_v33 }
 0x2d7   :  { %v1416_v21 = vadd.f32 %v1415_v11, %v1345_v58 }
 0x2d9   :  { %v1417_v16 = vadd.f32 %v1416_v21, %v1346_v2 }
 0x2da   :  { %v1156_v51 = vpop.f32.mrf.mxu3 }
 0x2db   :  { %v1418_v34 = vadd.f32 %v1417_v16, %v1347_v56  ;;  %1222 = vst [vmem:[#allocation10 + $0x1f8] sm:$0xff] %v1156_v51  ;;  %v1286_v22 = vsub.f32 %v1156_v51, %v2580_v36 }
 0x2dc   :  { %2123 = dma.vmem_to_hbm [thread:$0]  %s2116_s27, 8192, %s2118_s30, [#allocation6], %s2763_s1, %s2763_s1, %s2764_s13  }
 0x2dd   :  { %v1419_v35 = vadd.f32 %v1418_v34, %v1348_v50  ;;  %v1350_v28 = vmul.f32 %v1286_v22, %v1286_v22 }
 0x2df   :  { %v1420_v39 = vadd.f32 %v1419_v35, %v1349_v7 }
 0x2e1   :  { %v1421_v1 = vadd.f32 %v1420_v39, %v1350_v28 }
 0x2e3   :  { %v1422_v49 = vrot.slane %v1421_v1, 4 }
 0x2e5   :  { %v1423_v44 = vadd.f32 %v1422_v49, %v1421_v1 }
 0x2e7   :  { %v1424_v15 = vrot.slane %v1423_v44, 2 }
 0x2e9   :  { %v1425_v29 = vadd.f32 %v1424_v15, %v1423_v44 }
 0x2eb   :  { %v1426_v9 = vrot.slane %v1425_v29, 1 }
 0x2ed   :  { %v1427_v32 = vadd.f32 %v1426_v9, %v1425_v29 }
 0x2ef   :  { %v1428_v61 = vadd.f32 %v1427_v32, %v1358_v5 }
 0x2f1   :  { %1429 = vst [vmem:[#allocation2] sm:$0x1] %v1428_v61 }
 0x2f8   :  { %v2103_v43 = vld [vmem:[#allocation2] sm:$0x1] }
 0x2f9   :  { %2104 = vst [vmem:[#allocation13] sm:$0x1] %v2103_v43 }
 0x2fa   :  { %2151 = dma.vmem_to_hbm [thread:$0]  %s2147_s8, 16, %s2149_s11, [#allocation12]  }
 0x2fb   :  { %2753 = dma.done.wait [#allocation6], 8192  }
 0x2fc   :  { %2754 = vsyncadd [#allocation6], 4294959104 }
 0x2fd   :  { %2755 = dma.done.wait [#allocation12], 4112  }
 0x2fe   :  { %2756 = vsyncadd [#allocation12], 4294963184 }
 0x2ff   :  { %2757 = dma.done.wait [#allocation15], 16  }
 0x300   :  { %2758 = vsyncadd [#allocation15], 4294967280 }
 0x301   :  { %2179 = vsyncpa [#allocation5], 1 }
 0x302   :  { %2180 = vsyncpa [#allocation8], 1 }
 0x303   :  { %2181 = vsyncpa [#allocation6], 1 }
 0x304   :  { %2182 = vsyncpa [#allocation12], 1 }
 0x305   :  { %2183 = vsyncpa [#allocation15], 1 }

</bundles_post_ra>
